<compile_context>
chip_gen: v5e
topology: v5e:2x2
jax: 0.10.0
libtpu: 0.0.40
codegen_flags: <defaults>
</compile_context>

<pallas_src>
import jax
import jax.numpy as jnp
from jax import lax
from jax.experimental import pallas as pl
from jax.experimental.pallas import tpu as pltpu

N_FEAT = 28 * 28  # hard-coded in the PyTorch module


# ----------------------------------------------------------------------------
# Fused kernel factory (graph structure / iteration count are static)
# ----------------------------------------------------------------------------
def _make_fused_kernel(neighbors, color_partition, n_iters, proper_coloring):
    P = len(neighbors)
    degs = [float(len(nb)) for nb in neighbors]

    def kernel(hyp_ref,                         # SMEM: flat (n_iters*6,) |hyp|
               x_ref, y_ref, a0_ref, om0_ref,   # VMEM inputs (P, TB, *)
               a_ref, om_ref,                   # VMEM outputs = primal state
               mu_ref, lam_ref):                # VMEM scratch = dual state
        # --- per-batch-tile state init: a/omega from host init, duals zero ---
        a_ref[...] = a0_ref[...]
        om_ref[...] = om0_ref[...]
        mu_ref[...] = jnp.zeros_like(mu_ref)
        lam_ref[...] = jnp.zeros_like(lam_ref)

        def nbr_sums(p):
            # Toy path graph: unrolled per-neighbor loads + adds.
            # TODO(synk): for dense graphs, compute adj(P,P) @ reshape(a) on the
            # (otherwise idle) MXU instead of per-neighbor VALU adds.
            nbrs = neighbors[p]
            sa = a_ref[nbrs[0]]
            so = om_ref[nbrs[0]]
            for j in nbrs[1:]:
                sa = sa + a_ref[j]
                so = so + om_ref[j]
            return sa, so

        def node_update(p, h0, h1, h2, h5):
            Dp = degs[p]
            x = x_ref[p]                                   # (TB, Np)
            a_p = a_ref[p]                                 # (TB, Np)
            om_p = om_ref[p]                               # (TB, 1)
            sum_a, sum_om = nbr_sums(p)
            ip = jnp.sum(x * a_p, axis=-1, keepdims=True)  # inputs^T a, (TB, 1)
            resid = ip + om_p - y_ref[p]                   # shared residual
            # Step size folded into the gradient; the scalar pre-products ride
            # the free scalar slots (saves one full-width vmul + vsub / node).
            a_new = ((1.0 - h1 * h0 * Dp) * a_p
                     - x * (h1 * resid)
                     - (h1 * Dp) * mu_ref[p]
                     + (h1 * h0) * sum_a)
            om_new = ((1.0 - h5 * h2 * Dp) * om_p
                      - h5 * resid
                      - (h5 * Dp) * lam_ref[p]
                      + (h5 * h2) * sum_om)
            return a_new, om_new

        def iter_body(k, carry):
            base = k * 6
            h0 = hyp_ref[base + 0]   # rho_a
            h1 = hyp_ref[base + 1]   # lr_a
            h2 = hyp_ref[base + 2]   # rho_omega
            h3 = hyp_ref[base + 3]   # mu step
            h4 = hyp_ref[base + 4]   # lambda step
            h5 = hyp_ref[base + 5]   # lr_omega (hyp[...][-1])

            # ------------- primal updates, one proper color at a time --------
            for nodes in color_partition:
                if proper_coloring:
                    # Neighbors never share a color -> immediate writes are
                    # exactly the PyTorch a_aux/omega_aux semantics, and keep
                    # the number of live vregs bounded (no whole-color buffer).
                    for p in nodes:
                        a_new, om_new = node_update(p, h0, h1, h2, h5)
                        a_ref[p] = a_new
                        om_ref[p] = om_new
                else:
                    # Improper coloring: buffer the whole color before writing.
                    staged = [(p,) + node_update(p, h0, h1, h2, h5)
                              for p in nodes]
                    for p, a_new, om_new in staged:
                        a_ref[p] = a_new
                        om_ref[p] = om_new

            # ------------- dual updates (primal state frozen here) -----------
            for p in range(P):
                Dp = degs[p]
                sum_a, sum_om = nbr_sums(p)
                mu_ref[p] = mu_ref[p] + (h3 * Dp) * a_ref[p] - h3 * sum_a
                lam_ref[p] = lam_ref[p] + (h4 * Dp) * om_ref[p] - h4 * sum_om
            return carry

        # Body is already huge (fully specialized over nodes/colors); do not
        # unroll the iteration loop -- ILP within one iteration fills the VALU.
        lax.fori_loop(0, n_iters, iter_body, 0)

    return kernel


# ----------------------------------------------------------------------------
# Forward pass (test=False branch; returns (a, omega, loss_arr, acc_arr))
# ----------------------------------------------------------------------------
def dadmm_lr_same_forward(inputs, labels, hyp, neighbors, color_partition,
                          a0, omega0, max_iter_seg, ll=0, no_hyp=None,
                          batch_tile=None):
    """inputs: (P,B,N) f32, labels/omega0: (P,B,1) f32, hyp: (max_iter_seg,6)."""
    P, B, N = inputs.shape
    n_iters = max_iter_seg + ll

    # Per-iteration hyper-parameter row actually used by the module:
    #   k <  ll -> no_hyp[k] ;  k >= ll -> hyp[k - ll]
    if ll > 0:
        htab = jnp.concatenate([jnp.asarray(no_hyp, jnp.float32)[:ll],
                                jnp.asarray(hyp, jnp.float32)], axis=0)
    else:
        htab = jnp.asarray(hyp, jnp.float32)
    # |.| once on host; flatten to 1-D for SMEM (2-D [R,6] pads cols to 128).
    htab = jnp.abs(htab[:n_iters]).reshape(-1)

    # Pad feature axis to a multiple of 128 lanes (784 -> 896): unmasked vld/vst.
    # Padded columns of inputs/a/mu are zero and remain zero through the math.
    n_pad = (-N) % 128
    Np = N + n_pad
    x_p = jnp.pad(inputs.astype(jnp.float32), ((0, 0), (0, 0), (0, n_pad)))
    a0_p = jnp.pad(a0.astype(jnp.float32), ((0, 0), (0, 0), (0, n_pad)))
    labels = labels.astype(jnp.float32)
    omega0 = omega0.astype(jnp.float32)

    # Batch tile: D-ADMM coupling is only across nodes (P), never across batch,
    # so batch tiles are fully independent -> grid axis + "parallel" semantics.
    if (batch_tile is not None and B % batch_tile == 0
            and (batch_tile % 8 == 0 or batch_tile == B)):
        tb = batch_tile
    elif B % 8 == 0:
        tb = min(B, 8)
    else:
        tb = B
    n_bt = B // tb

    # Proper coloring <=> no node shares a color with one of its neighbors.
    proper = all(not (set(nodes) & set(neighbors[p]))
                 for nodes in color_partition for p in nodes)

    # NOTE: the `args.batch_size = m_p + m % args.P` reassignment in the PyTorch
    # code is a no-op here since inputs.shape[0] % P == 0.
    kernel = _make_fused_kernel(neighbors, color_partition, n_iters, proper)

    # Explicit VMEM budget (sized to the actual per-tile resident buffers, with
    # headroom): x + a0 inputs and a output double-buffered, mu scratch single.
    big = P * tb * Np * 4
    small = P * tb * 1 * 4
    vmem_needed = 2 * (3 * 2 * big + big + 3 * 2 * small + small) + (4 << 20)
    vmem_limit = int(max(32 << 20, min(vmem_needed, 64 << 20)))

    grid_spec = pltpu.PrefetchScalarGridSpec(
        num_scalar_prefetch=1,           # flat |hyp| table -> SMEM
        grid=(n_bt,),                    # independent batch tiles
        in_specs=[
            pl.BlockSpec((P, tb, Np), lambda b, h: (0, b, 0)),   # inputs
            pl.BlockSpec((P, tb, 1),  lambda b, h: (0, b, 0)),   # labels
            pl.BlockSpec((P, tb, Np), lambda b, h: (0, b, 0)),   # a init
            pl.BlockSpec((P, tb, 1),  lambda b, h: (0, b, 0)),   # omega init
        ],
        out_specs=[
            pl.BlockSpec((P, tb, Np), lambda b, h: (0, b, 0)),   # a
            pl.BlockSpec((P, tb, 1),  lambda b, h: (0, b, 0)),   # omega
        ],
        scratch_shapes=[
            pltpu.VMEM((P, tb, Np), jnp.float32),                # mu
            pltpu.VMEM((P, tb, 1), jnp.float32),                 # lambda
        ],
    )

    a_full, omega = pl.pallas_call(
        kernel,
        grid_spec=grid_spec,
        out_shape=(jax.ShapeDtypeStruct((P, B, Np), jnp.float32),
                   jax.ShapeDtypeStruct((P, B, 1), jnp.float32)),
        compiler_params=pltpu.CompilerParams(
            dimension_semantics=("parallel",),
            vmem_limit_bytes=vmem_limit),
        # a0 -> a, omega0 -> omega: reuse the HBM buffers, no extra allocation.
        # (Indices count the scalar-prefetch operand: htab=0, x=1, y=2, a0=3,
        #  omega0=4.)
        input_output_aliases={3: 0, 4: 1},
    )(htab, x_p, labels, a0_p, omega0)

    # One-time slice back to the module's feature width.  Keeping the padded
    # lane-dense (…, 896) layout downstream would avoid this extra copy.
    a = a_full[:, :, :N]
    loss_arr, acc_arr = [], []   # test=False: metrics are not accumulated
    return a, omega, loss_arr, acc_arr


# ----------------------------------------------------------------------------
# Pure-JAX reference (direct translation of the PyTorch module, ll=0 path)
# ----------------------------------------------------------------------------
def reference_forward(inputs, labels, hyp_abs, neighbors, color_partition,
                      a0, omega0, n_iters):
    P, B, N = inputs.shape
    a = [jnp.asarray(a0[p], jnp.float32) for p in range(P)]
    om = [jnp.asarray(omega0[p], jnp.float32) for p in range(P)]
    mu = [jnp.zeros((B, N), jnp.float32) for _ in range(P)]
    lam = [jnp.zeros((B, 1), jnp.float32) for _ in range(P)]

    def sums(p, av, ov):
        nbrs = neighbors[p]
        sa, so = av[nbrs[0]], ov[nbrs[0]]
        for j in nbrs[1:]:
            sa = sa + av[j]
            so = so + ov[j]
        return sa, so

    for k in range(n_iters):
        h = [float(hyp_abs[k, i]) for i in range(6)]
        for nodes in color_partition:
            a_new, om_new = {}, {}
            for p in nodes:
                Dp = float(len(neighbors[p]))
                sum_a, sum_om = sums(p, a, om)
                x, y = inputs[p], labels[p]
                ip = jnp.sum(x * a[p], axis=-1, keepdims=True)
                resid = ip + om[p] - y
                ga = x * resid + h[0] * a[p] * Dp + Dp * mu[p] - h[0] * sum_a
                go = resid + h[2] * om[p] * Dp + lam[p] * Dp - h[2] * sum_om
                a_new[p] = a[p] - h[1] * ga
                om_new[p] = om[p] - h[5] * go
            for p in nodes:
                a[p], om[p] = a_new[p], om_new[p]
        for p in range(P):
            Dp = float(len(neighbors[p]))
            sum_a, sum_om = sums(p, a, om)
            mu[p] = mu[p] + h[3] * (Dp * a[p] - sum_a)
            lam[p] = lam[p] + h[4] * (Dp * om[p] - sum_om)
    return jnp.stack(a), jnp.stack(om)


# ----------------------------------------------------------------------------
if __name__ == "__main__":
    P = 3            # nodes
    B = 16           # args.batch_size (tiled into 2 grid steps of 8)
    N = N_FEAT       # 28*28, hard-coded in the module
    MAX_ITER_SEG = 3
    LL = 0           # ll == 0 branch: no_hyp is None, hyp indexed by k

    # path graph 0 - 1 - 2, two proper colors
    neighbors = [[1], [0, 2], [1]]
    color_partition = [[0, 2], [1]]

    key = jax.random.PRNGKey(0)
    k_x, k_y, k_a, k_o, k_h = jax.random.split(key, 5)
    inputs = jax.random.normal(k_x, (P, B, N), jnp.float32)
    labels = jax.random.bernoulli(k_y, 0.5, (P, B, 1)).astype(jnp.float32)
    # deterministic init of a (normal) and omega (uniform), mirroring
    # torch.nn.init.normal_ / uniform_ (exact torch RNG stream not reproducible).
    a0 = jax.random.normal(k_a, (P, B, N), jnp.float32)
    omega0 = jax.random.uniform(k_o, (P, B, 1), jnp.float32)
    # hyp parameter: (MAX_ITER_SEG, 6) -> [rho_a, lr_a, rho_w, mu_step, lam_step, lr_w]
    base = jnp.array([0.1, 1e-4, 0.1, 1e-2, 1e-2, 1e-3], jnp.float32)
    signs = jnp.sign(jax.random.normal(k_h, (MAX_ITER_SEG, 6))) + 0.0
    hyp = base[None, :] * jnp.where(signs == 0, 1.0, signs)   # exercises torch.abs

    # Pure-JAX reference (computed first, in the unfused form of the module).
    a_ref, om_ref = reference_forward(inputs, labels, jnp.abs(hyp), neighbors,
                                      color_partition, a0, omega0, MAX_ITER_SEG)

    a_out, omega_out, loss_arr, acc_arr = dadmm_lr_same_forward(
        inputs, labels, hyp, neighbors, color_partition, a0, omega0,
        MAX_ITER_SEG, ll=LL, batch_tile=8)
    jax.block_until_ready((a_out, omega_out))

    assert jnp.allclose(a_out, a_ref, rtol=1e-4, atol=1e-4)
    assert jnp.allclose(omega_out, om_ref, rtol=1e-4, atol=1e-4)

    # TODO(synk): test=True metric branch (per-sample Python `if` on tensor values
    # for the accuracy heuristic) is host-side control flow, left unimplemented.
    # TODO(synk): PyTorch uses float64; TPU Pallas has no f64, so f32 drift over
    # long ADMM runs is an intentional deviation.
    print("KERNEL_OK")
</pallas_src>

<mosaic_0001>
module attributes {stable_mosaic.version = 11 : i64} {
  func.func @kernel(%arg0: i32, %arg1: memref<18xf32, #tpu.memory_space<smem>>, %arg2: memref<3x8x896xf32, #tpu.memory_space<vmem>>, %arg3: memref<3x8x1xf32, #tpu.memory_space<vmem>>, %arg4: memref<3x8x896xf32, #tpu.memory_space<vmem>>, %arg5: memref<3x8x1xf32, #tpu.memory_space<vmem>>, %arg6: memref<3x8x896xf32, #tpu.memory_space<vmem>>, %arg7: memref<3x8x1xf32, #tpu.memory_space<vmem>>, %arg8: memref<3x8x896xf32, #tpu.memory_space<vmem>>, %arg9: memref<3x8x1xf32, #tpu.memory_space<vmem>>) attributes {dimension_semantics = [#tpu.dimension_semantics<parallel>], iteration_bounds = array<i64: 2>, scalar_prefetch = 1 : i64, scratch_operands = 2 : i64, tpu.core_type = #tpu.core_type<tc>, window_params = [{transform_indices = @transform_0, window_bounds = array<i64: 3, 8, 896>}, {transform_indices = @transform_1, window_bounds = array<i64: 3, 8, 1>}, {transform_indices = @transform_2, window_bounds = array<i64: 3, 8, 896>}, {transform_indices = @transform_3, window_bounds = array<i64: 3, 8, 1>}, {transform_indices = @transform_4, window_bounds = array<i64: 3, 8, 896>}, {transform_indices = @transform_5, window_bounds = array<i64: 3, 8, 1>}]} {
    %c0 = arith.constant 0 : index
    %c0_0 = arith.constant 0 : index
    %c0_1 = arith.constant 0 : index
    %0 = vector.load %arg4[%c0, %c0_0, %c0_1] : memref<3x8x896xf32, #tpu.memory_space<vmem>>, vector<3x8x896xf32>
    %c0_2 = arith.constant 0 : index
    %c0_3 = arith.constant 0 : index
    %c0_4 = arith.constant 0 : index
    %1 = vector.load %arg6[%c0_2, %c0_3, %c0_4] : memref<3x8x896xf32, #tpu.memory_space<vmem>>, vector<3x8x896xf32>
    tpu.vector_store %arg6[%c0_2, %c0_3, %c0_4], %0 {strides = array<i32>} : memref<3x8x896xf32, #tpu.memory_space<vmem>>, vector<3x8x896xf32>,
    %c0_5 = arith.constant 0 : index
    %c0_6 = arith.constant 0 : index
    %c0_7 = arith.constant 0 : index
    %2 = vector.load %arg5[%c0_5, %c0_6, %c0_7] : memref<3x8x1xf32, #tpu.memory_space<vmem>>, vector<3x8x1xf32>
    %c0_8 = arith.constant 0 : index
    %c0_9 = arith.constant 0 : index
    %c0_10 = arith.constant 0 : index
    %3 = vector.load %arg7[%c0_8, %c0_9, %c0_10] : memref<3x8x1xf32, #tpu.memory_space<vmem>>, vector<3x8x1xf32>
    tpu.vector_store %arg7[%c0_8, %c0_9, %c0_10], %2 {strides = array<i32>} : memref<3x8x1xf32, #tpu.memory_space<vmem>>, vector<3x8x1xf32>,
    %cst = arith.constant 0.000000e+00 : f32
    %4 = vector.broadcast %cst : f32 to vector<3x8x896xf32>
    %c0_11 = arith.constant 0 : index
    %c0_12 = arith.constant 0 : index
    %c0_13 = arith.constant 0 : index
    %5 = vector.load %arg8[%c0_11, %c0_12, %c0_13] : memref<3x8x896xf32, #tpu.memory_space<vmem>>, vector<3x8x896xf32>
    tpu.vector_store %arg8[%c0_11, %c0_12, %c0_13], %4 {strides = array<i32>} : memref<3x8x896xf32, #tpu.memory_space<vmem>>, vector<3x8x896xf32>,
    %cst_14 = arith.constant 0.000000e+00 : f32
    %6 = vector.broadcast %cst_14 : f32 to vector<3x8x1xf32>
    %c0_15 = arith.constant 0 : index
    %c0_16 = arith.constant 0 : index
    %c0_17 = arith.constant 0 : index
    %7 = vector.load %arg9[%c0_15, %c0_16, %c0_17] : memref<3x8x1xf32, #tpu.memory_space<vmem>>, vector<3x8x1xf32>
    tpu.vector_store %arg9[%c0_15, %c0_16, %c0_17], %6 {strides = array<i32>} : memref<3x8x1xf32, #tpu.memory_space<vmem>>, vector<3x8x1xf32>,
    %c0_i32 = arith.constant 0 : i32
    %c3_i32 = arith.constant 3 : i32
    %8 = arith.addi %c0_i32, %c3_i32 : i32
    %c1_i32 = arith.constant 1 : i32
    scf.for %arg10 = %c0_i32 to %8 step %c1_i32  : i32 {
      %c6_i32 = arith.constant 6 : i32
      %9 = arith.muli %arg10, %c6_i32 : i32
      %c0_i32_19 = arith.constant 0 : i32
      %10 = arith.addi %9, %c0_i32_19 : i32
      %11 = arith.index_cast %10 : i32 to index
      %12 = memref.load %arg1[%11] : memref<18xf32, #tpu.memory_space<smem>>
      %c1_i32_20 = arith.constant 1 : i32
      %13 = arith.addi %9, %c1_i32_20 : i32
      %14 = arith.index_cast %13 : i32 to index
      %15 = memref.load %arg1[%14] : memref<18xf32, #tpu.memory_space<smem>>
      %c2_i32 = arith.constant 2 : i32
      %16 = arith.addi %9, %c2_i32 : i32
      %17 = arith.index_cast %16 : i32 to index
      %18 = memref.load %arg1[%17] : memref<18xf32, #tpu.memory_space<smem>>
      %c3_i32_21 = arith.constant 3 : i32
      %19 = arith.addi %9, %c3_i32_21 : i32
      %20 = arith.index_cast %19 : i32 to index
      %21 = memref.load %arg1[%20] : memref<18xf32, #tpu.memory_space<smem>>
      %c4_i32 = arith.constant 4 : i32
      %22 = arith.addi %9, %c4_i32 : i32
      %23 = arith.index_cast %22 : i32 to index
      %24 = memref.load %arg1[%23] : memref<18xf32, #tpu.memory_space<smem>>
      %c5_i32 = arith.constant 5 : i32
      %25 = arith.addi %9, %c5_i32 : i32
      %26 = arith.index_cast %25 : i32 to index
      %27 = memref.load %arg1[%26] : memref<18xf32, #tpu.memory_space<smem>>
      %c0_22 = arith.constant 0 : index
      %c0_23 = arith.constant 0 : index
      %c0_24 = arith.constant 0 : index
      %28 = vector.load %arg2[%c0_22, %c0_23, %c0_24] : memref<3x8x896xf32, #tpu.memory_space<vmem>>, vector<1x8x896xf32>
      %29 = vector.shape_cast %28 : vector<1x8x896xf32> to vector<8x896xf32>
      %c0_25 = arith.constant 0 : index
      %c0_26 = arith.constant 0 : index
      %c0_27 = arith.constant 0 : index
      %30 = vector.load %arg6[%c0_25, %c0_26, %c0_27] : memref<3x8x896xf32, #tpu.memory_space<vmem>>, vector<1x8x896xf32>
      %31 = vector.shape_cast %30 : vector<1x8x896xf32> to vector<8x896xf32>
      %c0_28 = arith.constant 0 : index
      %c0_29 = arith.constant 0 : index
      %c0_30 = arith.constant 0 : index
      %32 = vector.load %arg7[%c0_28, %c0_29, %c0_30] : memref<3x8x1xf32, #tpu.memory_space<vmem>>, vector<1x8x1xf32>
      %33 = vector.shape_cast %32 : vector<1x8x1xf32> to vector<8x1xf32>
      %c1 = arith.constant 1 : index
      %c0_31 = arith.constant 0 : index
      %c0_32 = arith.constant 0 : index
      %34 = vector.load %arg6[%c1, %c0_31, %c0_32] : memref<3x8x896xf32, #tpu.memory_space<vmem>>, vector<1x8x896xf32>
      %35 = vector.shape_cast %34 : vector<1x8x896xf32> to vector<8x896xf32>
      %c1_33 = arith.constant 1 : index
      %c0_34 = arith.constant 0 : index
      %c0_35 = arith.constant 0 : index
      %36 = vector.load %arg7[%c1_33, %c0_34, %c0_35] : memref<3x8x1xf32, #tpu.memory_space<vmem>>, vector<1x8x1xf32>
      %37 = vector.shape_cast %36 : vector<1x8x1xf32> to vector<8x1xf32>
      %38 = arith.mulf %29, %31 : vector<8x896xf32>
      %cst_36 = arith.constant dense<0.000000e+00> : vector<8xf32>
      %39 = vector.multi_reduction <add>, %38, %cst_36 [1] : vector<8x896xf32> to vector<8xf32>
      %40 = vector.shape_cast %39 : vector<8xf32> to vector<8x1xf32>
      %41 = arith.addf %40, %33 : vector<8x1xf32>
      %c0_37 = arith.constant 0 : index
      %c0_38 = arith.constant 0 : index
      %c0_39 = arith.constant 0 : index
      %42 = vector.load %arg3[%c0_37, %c0_38, %c0_39] : memref<3x8x1xf32, #tpu.memory_space<vmem>>, vector<1x8x1xf32>
      %43 = vector.shape_cast %42 : vector<1x8x1xf32> to vector<8x1xf32>
      %44 = arith.subf %41, %43 : vector<8x1xf32>
      %45 = arith.mulf %15, %12 : f32
      %cst_40 = arith.constant 1.000000e+00 : f32
      %46 = arith.mulf %45, %cst_40 : f32
      %cst_41 = arith.constant 1.000000e+00 : f32
      %47 = arith.subf %cst_41, %46 : f32
      %48 = vector.broadcast %47 : f32 to vector<8x896xf32>
      %49 = arith.mulf %48, %31 : vector<8x896xf32>
      %50 = vector.broadcast %15 : f32 to vector<8x1xf32>
      %51 = arith.mulf %50, %44 : vector<8x1xf32>
      %52 = vector.broadcast %51 : vector<8x1xf32> to vector<8x896xf32>
      %53 = arith.mulf %29, %52 : vector<8x896xf32>
      %54 = arith.subf %49, %53 : vector<8x896xf32>
      %cst_42 = arith.constant 1.000000e+00 : f32
      %55 = arith.mulf %15, %cst_42 : f32
      %c0_43 = arith.constant 0 : index
      %c0_44 = arith.constant 0 : index
      %c0_45 = arith.constant 0 : index
      %56 = vector.load %arg8[%c0_43, %c0_44, %c0_45] : memref<3x8x896xf32, #tpu.memory_space<vmem>>, vector<1x8x896xf32>
      %57 = vector.shape_cast %56 : vector<1x8x896xf32> to vector<8x896xf32>
      %58 = vector.broadcast %55 : f32 to vector<8x896xf32>
      %59 = arith.mulf %58, %57 : vector<8x896xf32>
      %60 = arith.subf %54, %59 : vector<8x896xf32>
      %61 = arith.mulf %15, %12 : f32
      %62 = vector.broadcast %61 : f32 to vector<8x896xf32>
      %63 = arith.mulf %62, %35 : vector<8x896xf32>
      %64 = arith.addf %60, %63 : vector<8x896xf32>
      %65 = arith.mulf %27, %18 : f32
      %cst_46 = arith.constant 1.000000e+00 : f32
      %66 = arith.mulf %65, %cst_46 : f32
      %cst_47 = arith.constant 1.000000e+00 : f32
      %67 = arith.subf %cst_47, %66 : f32
      %68 = vector.broadcast %67 : f32 to vector<8x1xf32>
      %69 = arith.mulf %68, %33 : vector<8x1xf32>
      %70 = vector.broadcast %27 : f32 to vector<8x1xf32>
      %71 = arith.mulf %70, %44 : vector<8x1xf32>
      %72 = arith.subf %69, %71 : vector<8x1xf32>
      %cst_48 = arith.constant 1.000000e+00 : f32
      %73 = arith.mulf %27, %cst_48 : f32
      %c0_49 = arith.constant 0 : index
      %c0_50 = arith.constant 0 : index
      %c0_51 = arith.constant 0 : index
      %74 = vector.load %arg9[%c0_49, %c0_50, %c0_51] : memref<3x8x1xf32, #tpu.memory_space<vmem>>, vector<1x8x1xf32>
      %75 = vector.shape_cast %74 : vector<1x8x1xf32> to vector<8x1xf32>
      %76 = vector.broadcast %73 : f32 to vector<8x1xf32>
      %77 = arith.mulf %76, %75 : vector<8x1xf32>
      %78 = arith.subf %72, %77 : vector<8x1xf32>
      %79 = arith.mulf %27, %18 : f32
      %80 = vector.broadcast %79 : f32 to vector<8x1xf32>
      %81 = arith.mulf %80, %37 : vector<8x1xf32>
      %82 = arith.addf %78, %81 : vector<8x1xf32>
      %c0_52 = arith.constant 0 : index
      %c0_53 = arith.constant 0 : index
      %c0_54 = arith.constant 0 : index
      %83 = vector.load %arg6[%c0_52, %c0_53, %c0_54] : memref<3x8x896xf32, #tpu.memory_space<vmem>>, vector<1x8x896xf32>
      %84 = vector.shape_cast %83 : vector<1x8x896xf32> to vector<8x896xf32>
      %85 = vector.shape_cast %64 : vector<8x896xf32> to vector<1x8x896xf32>
      tpu.vector_store %arg6[%c0_52, %c0_53, %c0_54], %85 {strides = array<i32>} : memref<3x8x896xf32, #tpu.memory_space<vmem>>, vector<1x8x896xf32>,
      %c0_55 = arith.constant 0 : index
      %c0_56 = arith.constant 0 : index
      %c0_57 = arith.constant 0 : index
      %86 = vector.load %arg7[%c0_55, %c0_56, %c0_57] : memref<3x8x1xf32, #tpu.memory_space<vmem>>, vector<1x8x1xf32>
      %87 = vector.shape_cast %86 : vector<1x8x1xf32> to vector<8x1xf32>
      %88 = vector.shape_cast %82 : vector<8x1xf32> to vector<1x8x1xf32>
      tpu.vector_store %arg7[%c0_55, %c0_56, %c0_57], %88 {strides = array<i32>} : memref<3x8x1xf32, #tpu.memory_space<vmem>>, vector<1x8x1xf32>,
      %c2 = arith.constant 2 : index
      %c0_58 = arith.constant 0 : index
      %c0_59 = arith.constant 0 : index
      %89 = vector.load %arg2[%c2, %c0_58, %c0_59] : memref<3x8x896xf32, #tpu.memory_space<vmem>>, vector<1x8x896xf32>
      %90 = vector.shape_cast %89 : vector<1x8x896xf32> to vector<8x896xf32>
      %c2_60 = arith.constant 2 : index
      %c0_61 = arith.constant 0 : index
      %c0_62 = arith.constant 0 : index
      %91 = vector.load %arg6[%c2_60, %c0_61, %c0_62] : memref<3x8x896xf32, #tpu.memory_space<vmem>>, vector<1x8x896xf32>
      %92 = vector.shape_cast %91 : vector<1x8x896xf32> to vector<8x896xf32>
      %c2_63 = arith.constant 2 : index
      %c0_64 = arith.constant 0 : index
      %c0_65 = arith.constant 0 : index
      %93 = vector.load %arg7[%c2_63, %c0_64, %c0_65] : memref<3x8x1xf32, #tpu.memory_space<vmem>>, vector<1x8x1xf32>
      %94 = vector.shape_cast %93 : vector<1x8x1xf32> to vector<8x1xf32>
      %c1_66 = arith.constant 1 : index
      %c0_67 = arith.constant 0 : index
      %c0_68 = arith.constant 0 : index
      %95 = vector.load %arg6[%c1_66, %c0_67, %c0_68] : memref<3x8x896xf32, #tpu.memory_space<vmem>>, vector<1x8x896xf32>
      %96 = vector.shape_cast %95 : vector<1x8x896xf32> to vector<8x896xf32>
      %c1_69 = arith.constant 1 : index
      %c0_70 = arith.constant 0 : index
      %c0_71 = arith.constant 0 : index
      %97 = vector.load %arg7[%c1_69, %c0_70, %c0_71] : memref<3x8x1xf32, #tpu.memory_space<vmem>>, vector<1x8x1xf32>
      %98 = vector.shape_cast %97 : vector<1x8x1xf32> to vector<8x1xf32>
      %99 = arith.mulf %90, %92 : vector<8x896xf32>
      %cst_72 = arith.constant dense<0.000000e+00> : vector<8xf32>
      %100 = vector.multi_reduction <add>, %99, %cst_72 [1] : vector<8x896xf32> to vector<8xf32>
      %101 = vector.shape_cast %100 : vector<8xf32> to vector<8x1xf32>
      %102 = arith.addf %101, %94 : vector<8x1xf32>
      %c2_73 = arith.constant 2 : index
      %c0_74 = arith.constant 0 : index
      %c0_75 = arith.constant 0 : index
      %103 = vector.load %arg3[%c2_73, %c0_74, %c0_75] : memref<3x8x1xf32, #tpu.memory_space<vmem>>, vector<1x8x1xf32>
      %104 = vector.shape_cast %103 : vector<1x8x1xf32> to vector<8x1xf32>
      %105 = arith.subf %102, %104 : vector<8x1xf32>
      %106 = arith.mulf %15, %12 : f32
      %cst_76 = arith.constant 1.000000e+00 : f32
      %107 = arith.mulf %106, %cst_76 : f32
      %cst_77 = arith.constant 1.000000e+00 : f32
      %108 = arith.subf %cst_77, %107 : f32
      %109 = vector.broadcast %108 : f32 to vector<8x896xf32>
      %110 = arith.mulf %109, %92 : vector<8x896xf32>
      %111 = vector.broadcast %15 : f32 to vector<8x1xf32>
      %112 = arith.mulf %111, %105 : vector<8x1xf32>
      %113 = vector.broadcast %112 : vector<8x1xf32> to vector<8x896xf32>
      %114 = arith.mulf %90, %113 : vector<8x896xf32>
      %115 = arith.subf %110, %114 : vector<8x896xf32>
      %cst_78 = arith.constant 1.000000e+00 : f32
      %116 = arith.mulf %15, %cst_78 : f32
      %c2_79 = arith.constant 2 : index
      %c0_80 = arith.constant 0 : index
      %c0_81 = arith.constant 0 : index
      %117 = vector.load %arg8[%c2_79, %c0_80, %c0_81] : memref<3x8x896xf32, #tpu.memory_space<vmem>>, vector<1x8x896xf32>
      %118 = vector.shape_cast %117 : vector<1x8x896xf32> to vector<8x896xf32>
      %119 = vector.broadcast %116 : f32 to vector<8x896xf32>
      %120 = arith.mulf %119, %118 : vector<8x896xf32>
      %121 = arith.subf %115, %120 : vector<8x896xf32>
      %122 = arith.mulf %15, %12 : f32
      %123 = vector.broadcast %122 : f32 to vector<8x896xf32>
      %124 = arith.mulf %123, %96 : vector<8x896xf32>
      %125 = arith.addf %121, %124 : vector<8x896xf32>
      %126 = arith.mulf %27, %18 : f32
      %cst_82 = arith.constant 1.000000e+00 : f32
      %127 = arith.mulf %126, %cst_82 : f32
      %cst_83 = arith.constant 1.000000e+00 : f32
      %128 = arith.subf %cst_83, %127 : f32
      %129 = vector.broadcast %128 : f32 to vector<8x1xf32>
      %130 = arith.mulf %129, %94 : vector<8x1xf32>
      %131 = vector.broadcast %27 : f32 to vector<8x1xf32>
      %132 = arith.mulf %131, %105 : vector<8x1xf32>
      %133 = arith.subf %130, %132 : vector<8x1xf32>
      %cst_84 = arith.constant 1.000000e+00 : f32
      %134 = arith.mulf %27, %cst_84 : f32
      %c2_85 = arith.constant 2 : index
      %c0_86 = arith.constant 0 : index
      %c0_87 = arith.constant 0 : index
      %135 = vector.load %arg9[%c2_85, %c0_86, %c0_87] : memref<3x8x1xf32, #tpu.memory_space<vmem>>, vector<1x8x1xf32>
      %136 = vector.shape_cast %135 : vector<1x8x1xf32> to vector<8x1xf32>
      %137 = vector.broadcast %134 : f32 to vector<8x1xf32>
      %138 = arith.mulf %137, %136 : vector<8x1xf32>
      %139 = arith.subf %133, %138 : vector<8x1xf32>
      %140 = arith.mulf %27, %18 : f32
      %141 = vector.broadcast %140 : f32 to vector<8x1xf32>
      %142 = arith.mulf %141, %98 : vector<8x1xf32>
      %143 = arith.addf %139, %142 : vector<8x1xf32>
      %c2_88 = arith.constant 2 : index
      %c0_89 = arith.constant 0 : index
      %c0_90 = arith.constant 0 : index
      %144 = vector.load %arg6[%c2_88, %c0_89, %c0_90] : memref<3x8x896xf32, #tpu.memory_space<vmem>>, vector<1x8x896xf32>
      %145 = vector.shape_cast %144 : vector<1x8x896xf32> to vector<8x896xf32>
      %146 = vector.shape_cast %125 : vector<8x896xf32> to vector<1x8x896xf32>
      tpu.vector_store %arg6[%c2_88, %c0_89, %c0_90], %146 {strides = array<i32>} : memref<3x8x896xf32, #tpu.memory_space<vmem>>, vector<1x8x896xf32>,
      %c2_91 = arith.constant 2 : index
      %c0_92 = arith.constant 0 : index
      %c0_93 = arith.constant 0 : index
      %147 = vector.load %arg7[%c2_91, %c0_92, %c0_93] : memref<3x8x1xf32, #tpu.memory_space<vmem>>, vector<1x8x1xf32>
      %148 = vector.shape_cast %147 : vector<1x8x1xf32> to vector<8x1xf32>
      %149 = vector.shape_cast %143 : vector<8x1xf32> to vector<1x8x1xf32>
      tpu.vector_store %arg7[%c2_91, %c0_92, %c0_93], %149 {strides = array<i32>} : memref<3x8x1xf32, #tpu.memory_space<vmem>>, vector<1x8x1xf32>,
      %c1_94 = arith.constant 1 : index
      %c0_95 = arith.constant 0 : index
      %c0_96 = arith.constant 0 : index
      %150 = vector.load %arg2[%c1_94, %c0_95, %c0_96] : memref<3x8x896xf32, #tpu.memory_space<vmem>>, vector<1x8x896xf32>
      %151 = vector.shape_cast %150 : vector<1x8x896xf32> to vector<8x896xf32>
      %c1_97 = arith.constant 1 : index
      %c0_98 = arith.constant 0 : index
      %c0_99 = arith.constant 0 : index
      %152 = vector.load %arg6[%c1_97, %c0_98, %c0_99] : memref<3x8x896xf32, #tpu.memory_space<vmem>>, vector<1x8x896xf32>
      %153 = vector.shape_cast %152 : vector<1x8x896xf32> to vector<8x896xf32>
      %c1_100 = arith.constant 1 : index
      %c0_101 = arith.constant 0 : index
      %c0_102 = arith.constant 0 : index
      %154 = vector.load %arg7[%c1_100, %c0_101, %c0_102] : memref<3x8x1xf32, #tpu.memory_space<vmem>>, vector<1x8x1xf32>
      %155 = vector.shape_cast %154 : vector<1x8x1xf32> to vector<8x1xf32>
      %c0_103 = arith.constant 0 : index
      %c0_104 = arith.constant 0 : index
      %c0_105 = arith.constant 0 : index
      %156 = vector.load %arg6[%c0_103, %c0_104, %c0_105] : memref<3x8x896xf32, #tpu.memory_space<vmem>>, vector<1x8x896xf32>
      %157 = vector.shape_cast %156 : vector<1x8x896xf32> to vector<8x896xf32>
      %c0_106 = arith.constant 0 : index
      %c0_107 = arith.constant 0 : index
      %c0_108 = arith.constant 0 : index
      %158 = vector.load %arg7[%c0_106, %c0_107, %c0_108] : memref<3x8x1xf32, #tpu.memory_space<vmem>>, vector<1x8x1xf32>
      %159 = vector.shape_cast %158 : vector<1x8x1xf32> to vector<8x1xf32>
      %c2_109 = arith.constant 2 : index
      %c0_110 = arith.constant 0 : index
      %c0_111 = arith.constant 0 : index
      %160 = vector.load %arg6[%c2_109, %c0_110, %c0_111] : memref<3x8x896xf32, #tpu.memory_space<vmem>>, vector<1x8x896xf32>
      %161 = vector.shape_cast %160 : vector<1x8x896xf32> to vector<8x896xf32>
      %162 = arith.addf %157, %161 : vector<8x896xf32>
      %c2_112 = arith.constant 2 : index
      %c0_113 = arith.constant 0 : index
      %c0_114 = arith.constant 0 : index
      %163 = vector.load %arg7[%c2_112, %c0_113, %c0_114] : memref<3x8x1xf32, #tpu.memory_space<vmem>>, vector<1x8x1xf32>
      %164 = vector.shape_cast %163 : vector<1x8x1xf32> to vector<8x1xf32>
      %165 = arith.addf %159, %164 : vector<8x1xf32>
      %166 = arith.mulf %151, %153 : vector<8x896xf32>
      %cst_115 = arith.constant dense<0.000000e+00> : vector<8xf32>
      %167 = vector.multi_reduction <add>, %166, %cst_115 [1] : vector<8x896xf32> to vector<8xf32>
      %168 = vector.shape_cast %167 : vector<8xf32> to vector<8x1xf32>
      %169 = arith.addf %168, %155 : vector<8x1xf32>
      %c1_116 = arith.constant 1 : index
      %c0_117 = arith.constant 0 : index
      %c0_118 = arith.constant 0 : index
      %170 = vector.load %arg3[%c1_116, %c0_117, %c0_118] : memref<3x8x1xf32, #tpu.memory_space<vmem>>, vector<1x8x1xf32>
      %171 = vector.shape_cast %170 : vector<1x8x1xf32> to vector<8x1xf32>
      %172 = arith.subf %169, %171 : vector<8x1xf32>
      %173 = arith.mulf %15, %12 : f32
      %cst_119 = arith.constant 2.000000e+00 : f32
      %174 = arith.mulf %173, %cst_119 : f32
      %cst_120 = arith.constant 1.000000e+00 : f32
      %175 = arith.subf %cst_120, %174 : f32
      %176 = vector.broadcast %175 : f32 to vector<8x896xf32>
      %177 = arith.mulf %176, %153 : vector<8x896xf32>
      %178 = vector.broadcast %15 : f32 to vector<8x1xf32>
      %179 = arith.mulf %178, %172 : vector<8x1xf32>
      %180 = vector.broadcast %179 : vector<8x1xf32> to vector<8x896xf32>
      %181 = arith.mulf %151, %180 : vector<8x896xf32>
      %182 = arith.subf %177, %181 : vector<8x896xf32>
      %cst_121 = arith.constant 2.000000e+00 : f32
      %183 = arith.mulf %15, %cst_121 : f32
      %c1_122 = arith.constant 1 : index
      %c0_123 = arith.constant 0 : index
      %c0_124 = arith.constant 0 : index
      %184 = vector.load %arg8[%c1_122, %c0_123, %c0_124] : memref<3x8x896xf32, #tpu.memory_space<vmem>>, vector<1x8x896xf32>
      %185 = vector.shape_cast %184 : vector<1x8x896xf32> to vector<8x896xf32>
      %186 = vector.broadcast %183 : f32 to vector<8x896xf32>
      %187 = arith.mulf %186, %185 : vector<8x896xf32>
      %188 = arith.subf %182, %187 : vector<8x896xf32>
      %189 = arith.mulf %15, %12 : f32
      %190 = vector.broadcast %189 : f32 to vector<8x896xf32>
      %191 = arith.mulf %190, %162 : vector<8x896xf32>
      %192 = arith.addf %188, %191 : vector<8x896xf32>
      %193 = arith.mulf %27, %18 : f32
      %cst_125 = arith.constant 2.000000e+00 : f32
      %194 = arith.mulf %193, %cst_125 : f32
      %cst_126 = arith.constant 1.000000e+00 : f32
      %195 = arith.subf %cst_126, %194 : f32
      %196 = vector.broadcast %195 : f32 to vector<8x1xf32>
      %197 = arith.mulf %196, %155 : vector<8x1xf32>
      %198 = vector.broadcast %27 : f32 to vector<8x1xf32>
      %199 = arith.mulf %198, %172 : vector<8x1xf32>
      %200 = arith.subf %197, %199 : vector<8x1xf32>
      %cst_127 = arith.constant 2.000000e+00 : f32
      %201 = arith.mulf %27, %cst_127 : f32
      %c1_128 = arith.constant 1 : index
      %c0_129 = arith.constant 0 : index
      %c0_130 = arith.constant 0 : index
      %202 = vector.load %arg9[%c1_128, %c0_129, %c0_130] : memref<3x8x1xf32, #tpu.memory_space<vmem>>, vector<1x8x1xf32>
      %203 = vector.shape_cast %202 : vector<1x8x1xf32> to vector<8x1xf32>
      %204 = vector.broadcast %201 : f32 to vector<8x1xf32>
      %205 = arith.mulf %204, %203 : vector<8x1xf32>
      %206 = arith.subf %200, %205 : vector<8x1xf32>
      %207 = arith.mulf %27, %18 : f32
      %208 = vector.broadcast %207 : f32 to vector<8x1xf32>
      %209 = arith.mulf %208, %165 : vector<8x1xf32>
      %210 = arith.addf %206, %209 : vector<8x1xf32>
      %c1_131 = arith.constant 1 : index
      %c0_132 = arith.constant 0 : index
      %c0_133 = arith.constant 0 : index
      %211 = vector.load %arg6[%c1_131, %c0_132, %c0_133] : memref<3x8x896xf32, #tpu.memory_space<vmem>>, vector<1x8x896xf32>
      %212 = vector.shape_cast %211 : vector<1x8x896xf32> to vector<8x896xf32>
      %213 = vector.shape_cast %192 : vector<8x896xf32> to vector<1x8x896xf32>
      tpu.vector_store %arg6[%c1_131, %c0_132, %c0_133], %213 {strides = array<i32>} : memref<3x8x896xf32, #tpu.memory_space<vmem>>, vector<1x8x896xf32>,
      %c1_134 = arith.constant 1 : index
      %c0_135 = arith.constant 0 : index
      %c0_136 = arith.constant 0 : index
      %214 = vector.load %arg7[%c1_134, %c0_135, %c0_136] : memref<3x8x1xf32, #tpu.memory_space<vmem>>, vector<1x8x1xf32>
      %215 = vector.shape_cast %214 : vector<1x8x1xf32> to vector<8x1xf32>
      %216 = vector.shape_cast %210 : vector<8x1xf32> to vector<1x8x1xf32>
      tpu.vector_store %arg7[%c1_134, %c0_135, %c0_136], %216 {strides = array<i32>} : memref<3x8x1xf32, #tpu.memory_space<vmem>>, vector<1x8x1xf32>,
      %c1_137 = arith.constant 1 : index
      %c0_138 = arith.constant 0 : index
      %c0_139 = arith.constant 0 : index
      %217 = vector.load %arg6[%c1_137, %c0_138, %c0_139] : memref<3x8x896xf32, #tpu.memory_space<vmem>>, vector<1x8x896xf32>
      %218 = vector.shape_cast %217 : vector<1x8x896xf32> to vector<8x896xf32>
      %c1_140 = arith.constant 1 : index
      %c0_141 = arith.constant 0 : index
      %c0_142 = arith.constant 0 : index
      %219 = vector.load %arg7[%c1_140, %c0_141, %c0_142] : memref<3x8x1xf32, #tpu.memory_space<vmem>>, vector<1x8x1xf32>
      %220 = vector.shape_cast %219 : vector<1x8x1xf32> to vector<8x1xf32>
      %c0_143 = arith.constant 0 : index
      %c0_144 = arith.constant 0 : index
      %c0_145 = arith.constant 0 : index
      %221 = vector.load %arg8[%c0_143, %c0_144, %c0_145] : memref<3x8x896xf32, #tpu.memory_space<vmem>>, vector<1x8x896xf32>
      %222 = vector.shape_cast %221 : vector<1x8x896xf32> to vector<8x896xf32>
      %cst_146 = arith.constant 1.000000e+00 : f32
      %223 = arith.mulf %21, %cst_146 : f32
      %c0_147 = arith.constant 0 : index
      %c0_148 = arith.constant 0 : index
      %c0_149 = arith.constant 0 : index
      %224 = vector.load %arg6[%c0_147, %c0_148, %c0_149] : memref<3x8x896xf32, #tpu.memory_space<vmem>>, vector<1x8x896xf32>
      %225 = vector.shape_cast %224 : vector<1x8x896xf32> to vector<8x896xf32>
      %226 = vector.broadcast %223 : f32 to vector<8x896xf32>
      %227 = arith.mulf %226, %225 : vector<8x896xf32>
      %228 = arith.addf %222, %227 : vector<8x896xf32>
      %229 = vector.broadcast %21 : f32 to vector<8x896xf32>
      %230 = arith.mulf %229, %218 : vector<8x896xf32>
      %231 = arith.subf %228, %230 : vector<8x896xf32>
      %c0_150 = arith.constant 0 : index
      %c0_151 = arith.constant 0 : index
      %c0_152 = arith.constant 0 : index
      %232 = vector.load %arg8[%c0_150, %c0_151, %c0_152] : memref<3x8x896xf32, #tpu.memory_space<vmem>>, vector<1x8x896xf32>
      %233 = vector.shape_cast %232 : vector<1x8x896xf32> to vector<8x896xf32>
      %234 = vector.shape_cast %231 : vector<8x896xf32> to vector<1x8x896xf32>
      tpu.vector_store %arg8[%c0_150, %c0_151, %c0_152], %234 {strides = array<i32>} : memref<3x8x896xf32, #tpu.memory_space<vmem>>, vector<1x8x896xf32>,
      %c0_153 = arith.constant 0 : index
      %c0_154 = arith.constant 0 : index
      %c0_155 = arith.constant 0 : index
      %235 = vector.load %arg9[%c0_153, %c0_154, %c0_155] : memref<3x8x1xf32, #tpu.memory_space<vmem>>, vector<1x8x1xf32>
      %236 = vector.shape_cast %235 : vector<1x8x1xf32> to vector<8x1xf32>
      %cst_156 = arith.constant 1.000000e+00 : f32
      %237 = arith.mulf %24, %cst_156 : f32
      %c0_157 = arith.constant 0 : index
      %c0_158 = arith.constant 0 : index
      %c0_159 = arith.constant 0 : index
      %238 = vector.load %arg7[%c0_157, %c0_158, %c0_159] : memref<3x8x1xf32, #tpu.memory_space<vmem>>, vector<1x8x1xf32>
      %239 = vector.shape_cast %238 : vector<1x8x1xf32> to vector<8x1xf32>
      %240 = vector.broadcast %237 : f32 to vector<8x1xf32>
      %241 = arith.mulf %240, %239 : vector<8x1xf32>
      %242 = arith.addf %236, %241 : vector<8x1xf32>
      %243 = vector.broadcast %24 : f32 to vector<8x1xf32>
      %244 = arith.mulf %243, %220 : vector<8x1xf32>
      %245 = arith.subf %242, %244 : vector<8x1xf32>
      %c0_160 = arith.constant 0 : index
      %c0_161 = arith.constant 0 : index
      %c0_162 = arith.constant 0 : index
      %246 = vector.load %arg9[%c0_160, %c0_161, %c0_162] : memref<3x8x1xf32, #tpu.memory_space<vmem>>, vector<1x8x1xf32>
      %247 = vector.shape_cast %246 : vector<1x8x1xf32> to vector<8x1xf32>
      %248 = vector.shape_cast %245 : vector<8x1xf32> to vector<1x8x1xf32>
      tpu.vector_store %arg9[%c0_160, %c0_161, %c0_162], %248 {strides = array<i32>} : memref<3x8x1xf32, #tpu.memory_space<vmem>>, vector<1x8x1xf32>,
      %c0_163 = arith.constant 0 : index
      %c0_164 = arith.constant 0 : index
      %c0_165 = arith.constant 0 : index
      %249 = vector.load %arg6[%c0_163, %c0_164, %c0_165] : memref<3x8x896xf32, #tpu.memory_space<vmem>>, vector<1x8x896xf32>
      %250 = vector.shape_cast %249 : vector<1x8x896xf32> to vector<8x896xf32>
      %c0_166 = arith.constant 0 : index
      %c0_167 = arith.constant 0 : index
      %c0_168 = arith.constant 0 : index
      %251 = vector.load %arg7[%c0_166, %c0_167, %c0_168] : memref<3x8x1xf32, #tpu.memory_space<vmem>>, vector<1x8x1xf32>
      %252 = vector.shape_cast %251 : vector<1x8x1xf32> to vector<8x1xf32>
      %c2_169 = arith.constant 2 : index
      %c0_170 = arith.constant 0 : index
      %c0_171 = arith.constant 0 : index
      %253 = vector.load %arg6[%c2_169, %c0_170, %c0_171] : memref<3x8x896xf32, #tpu.memory_space<vmem>>, vector<1x8x896xf32>
      %254 = vector.shape_cast %253 : vector<1x8x896xf32> to vector<8x896xf32>
      %255 = arith.addf %250, %254 : vector<8x896xf32>
      %c2_172 = arith.constant 2 : index
      %c0_173 = arith.constant 0 : index
      %c0_174 = arith.constant 0 : index
      %256 = vector.load %arg7[%c2_172, %c0_173, %c0_174] : memref<3x8x1xf32, #tpu.memory_space<vmem>>, vector<1x8x1xf32>
      %257 = vector.shape_cast %256 : vector<1x8x1xf32> to vector<8x1xf32>
      %258 = arith.addf %252, %257 : vector<8x1xf32>
      %c1_175 = arith.constant 1 : index
      %c0_176 = arith.constant 0 : index
      %c0_177 = arith.constant 0 : index
      %259 = vector.load %arg8[%c1_175, %c0_176, %c0_177] : memref<3x8x896xf32, #tpu.memory_space<vmem>>, vector<1x8x896xf32>
      %260 = vector.shape_cast %259 : vector<1x8x896xf32> to vector<8x896xf32>
      %cst_178 = arith.constant 2.000000e+00 : f32
      %261 = arith.mulf %21, %cst_178 : f32
      %c1_179 = arith.constant 1 : index
      %c0_180 = arith.constant 0 : index
      %c0_181 = arith.constant 0 : index
      %262 = vector.load %arg6[%c1_179, %c0_180, %c0_181] : memref<3x8x896xf32, #tpu.memory_space<vmem>>, vector<1x8x896xf32>
      %263 = vector.shape_cast %262 : vector<1x8x896xf32> to vector<8x896xf32>
      %264 = vector.broadcast %261 : f32 to vector<8x896xf32>
      %265 = arith.mulf %264, %263 : vector<8x896xf32>
      %266 = arith.addf %260, %265 : vector<8x896xf32>
      %267 = vector.broadcast %21 : f32 to vector<8x896xf32>
      %268 = arith.mulf %267, %255 : vector<8x896xf32>
      %269 = arith.subf %266, %268 : vector<8x896xf32>
      %c1_182 = arith.constant 1 : index
      %c0_183 = arith.constant 0 : index
      %c0_184 = arith.constant 0 : index
      %270 = vector.load %arg8[%c1_182, %c0_183, %c0_184] : memref<3x8x896xf32, #tpu.memory_space<vmem>>, vector<1x8x896xf32>
      %271 = vector.shape_cast %270 : vector<1x8x896xf32> to vector<8x896xf32>
      %272 = vector.shape_cast %269 : vector<8x896xf32> to vector<1x8x896xf32>
      tpu.vector_store %arg8[%c1_182, %c0_183, %c0_184], %272 {strides = array<i32>} : memref<3x8x896xf32, #tpu.memory_space<vmem>>, vector<1x8x896xf32>,
      %c1_185 = arith.constant 1 : index
      %c0_186 = arith.constant 0 : index
      %c0_187 = arith.constant 0 : index
      %273 = vector.load %arg9[%c1_185, %c0_186, %c0_187] : memref<3x8x1xf32, #tpu.memory_space<vmem>>, vector<1x8x1xf32>
      %274 = vector.shape_cast %273 : vector<1x8x1xf32> to vector<8x1xf32>
      %cst_188 = arith.constant 2.000000e+00 : f32
      %275 = arith.mulf %24, %cst_188 : f32
      %c1_189 = arith.constant 1 : index
      %c0_190 = arith.constant 0 : index
      %c0_191 = arith.constant 0 : index
      %276 = vector.load %arg7[%c1_189, %c0_190, %c0_191] : memref<3x8x1xf32, #tpu.memory_space<vmem>>, vector<1x8x1xf32>
      %277 = vector.shape_cast %276 : vector<1x8x1xf32> to vector<8x1xf32>
      %278 = vector.broadcast %275 : f32 to vector<8x1xf32>
      %279 = arith.mulf %278, %277 : vector<8x1xf32>
      %280 = arith.addf %274, %279 : vector<8x1xf32>
      %281 = vector.broadcast %24 : f32 to vector<8x1xf32>
      %282 = arith.mulf %281, %258 : vector<8x1xf32>
      %283 = arith.subf %280, %282 : vector<8x1xf32>
      %c1_192 = arith.constant 1 : index
      %c0_193 = arith.constant 0 : index
      %c0_194 = arith.constant 0 : index
      %284 = vector.load %arg9[%c1_192, %c0_193, %c0_194] : memref<3x8x1xf32, #tpu.memory_space<vmem>>, vector<1x8x1xf32>
      %285 = vector.shape_cast %284 : vector<1x8x1xf32> to vector<8x1xf32>
      %286 = vector.shape_cast %283 : vector<8x1xf32> to vector<1x8x1xf32>
      tpu.vector_store %arg9[%c1_192, %c0_193, %c0_194], %286 {strides = array<i32>} : memref<3x8x1xf32, #tpu.memory_space<vmem>>, vector<1x8x1xf32>,
      %c1_195 = arith.constant 1 : index
      %c0_196 = arith.constant 0 : index
      %c0_197 = arith.constant 0 : index
      %287 = vector.load %arg6[%c1_195, %c0_196, %c0_197] : memref<3x8x896xf32, #tpu.memory_space<vmem>>, vector<1x8x896xf32>
      %288 = vector.shape_cast %287 : vector<1x8x896xf32> to vector<8x896xf32>
      %c1_198 = arith.constant 1 : index
      %c0_199 = arith.constant 0 : index
      %c0_200 = arith.constant 0 : index
      %289 = vector.load %arg7[%c1_198, %c0_199, %c0_200] : memref<3x8x1xf32, #tpu.memory_space<vmem>>, vector<1x8x1xf32>
      %290 = vector.shape_cast %289 : vector<1x8x1xf32> to vector<8x1xf32>
      %c2_201 = arith.constant 2 : index
      %c0_202 = arith.constant 0 : index
      %c0_203 = arith.constant 0 : index
      %291 = vector.load %arg8[%c2_201, %c0_202, %c0_203] : memref<3x8x896xf32, #tpu.memory_space<vmem>>, vector<1x8x896xf32>
      %292 = vector.shape_cast %291 : vector<1x8x896xf32> to vector<8x896xf32>
      %cst_204 = arith.constant 1.000000e+00 : f32
      %293 = arith.mulf %21, %cst_204 : f32
      %c2_205 = arith.constant 2 : index
      %c0_206 = arith.constant 0 : index
      %c0_207 = arith.constant 0 : index
      %294 = vector.load %arg6[%c2_205, %c0_206, %c0_207] : memref<3x8x896xf32, #tpu.memory_space<vmem>>, vector<1x8x896xf32>
      %295 = vector.shape_cast %294 : vector<1x8x896xf32> to vector<8x896xf32>
      %296 = vector.broadcast %293 : f32 to vector<8x896xf32>
      %297 = arith.mulf %296, %295 : vector<8x896xf32>
      %298 = arith.addf %292, %297 : vector<8x896xf32>
      %299 = vector.broadcast %21 : f32 to vector<8x896xf32>
      %300 = arith.mulf %299, %288 : vector<8x896xf32>
      %301 = arith.subf %298, %300 : vector<8x896xf32>
      %c2_208 = arith.constant 2 : index
      %c0_209 = arith.constant 0 : index
      %c0_210 = arith.constant 0 : index
      %302 = vector.load %arg8[%c2_208, %c0_209, %c0_210] : memref<3x8x896xf32, #tpu.memory_space<vmem>>, vector<1x8x896xf32>
      %303 = vector.shape_cast %302 : vector<1x8x896xf32> to vector<8x896xf32>
      %304 = vector.shape_cast %301 : vector<8x896xf32> to vector<1x8x896xf32>
      tpu.vector_store %arg8[%c2_208, %c0_209, %c0_210], %304 {strides = array<i32>} : memref<3x8x896xf32, #tpu.memory_space<vmem>>, vector<1x8x896xf32>,
      %c2_211 = arith.constant 2 : index
      %c0_212 = arith.constant 0 : index
      %c0_213 = arith.constant 0 : index
      %305 = vector.load %arg9[%c2_211, %c0_212, %c0_213] : memref<3x8x1xf32, #tpu.memory_space<vmem>>, vector<1x8x1xf32>
      %306 = vector.shape_cast %305 : vector<1x8x1xf32> to vector<8x1xf32>
      %cst_214 = arith.constant 1.000000e+00 : f32
      %307 = arith.mulf %24, %cst_214 : f32
      %c2_215 = arith.constant 2 : index
      %c0_216 = arith.constant 0 : index
      %c0_217 = arith.constant 0 : index
      %308 = vector.load %arg7[%c2_215, %c0_216, %c0_217] : memref<3x8x1xf32, #tpu.memory_space<vmem>>, vector<1x8x1xf32>
      %309 = vector.shape_cast %308 : vector<1x8x1xf32> to vector<8x1xf32>
      %310 = vector.broadcast %307 : f32 to vector<8x1xf32>
      %311 = arith.mulf %310, %309 : vector<8x1xf32>
      %312 = arith.addf %306, %311 : vector<8x1xf32>
      %313 = vector.broadcast %24 : f32 to vector<8x1xf32>
      %314 = arith.mulf %313, %290 : vector<8x1xf32>
      %315 = arith.subf %312, %314 : vector<8x1xf32>
      %c2_218 = arith.constant 2 : index
      %c0_219 = arith.constant 0 : index
      %c0_220 = arith.constant 0 : index
      %316 = vector.load %arg9[%c2_218, %c0_219, %c0_220] : memref<3x8x1xf32, #tpu.memory_space<vmem>>, vector<1x8x1xf32>
      %317 = vector.shape_cast %316 : vector<1x8x1xf32> to vector<8x1xf32>
      %318 = vector.shape_cast %315 : vector<8x1xf32> to vector<1x8x1xf32>
      tpu.vector_store %arg9[%c2_218, %c0_219, %c0_220], %318 {strides = array<i32>} : memref<3x8x1xf32, #tpu.memory_space<vmem>>, vector<1x8x1xf32>,
    }
    %c3_i32_18 = arith.constant 3 : i32
    return
  }
  func.func @transform_0(%arg0: i32, %arg1: memref<18xf32, #tpu.memory_space<smem>>) -> (i32, i32, i32) {
    %c0_i32 = arith.constant 0 : i32
    %c0_i32_0 = arith.constant 0 : i32
    %c0_i32_1 = arith.constant 0 : i32
    return %c0_i32, %arg0, %c0_i32_0 : i32, i32, i32
  }
  func.func @transform_1(%arg0: i32, %arg1: memref<18xf32, #tpu.memory_space<smem>>) -> (i32, i32, i32) {
    %c0_i32 = arith.constant 0 : i32
    %c0_i32_0 = arith.constant 0 : i32
    %c0_i32_1 = arith.constant 0 : i32
    return %c0_i32, %arg0, %c0_i32_0 : i32, i32, i32
  }
  func.func @transform_2(%arg0: i32, %arg1: memref<18xf32, #tpu.memory_space<smem>>) -> (i32, i32, i32) {
    %c0_i32 = arith.constant 0 : i32
    %c0_i32_0 = arith.constant 0 : i32
    %c0_i32_1 = arith.constant 0 : i32
    return %c0_i32, %arg0, %c0_i32_0 : i32, i32, i32
  }
  func.func @transform_3(%arg0: i32, %arg1: memref<18xf32, #tpu.memory_space<smem>>) -> (i32, i32, i32) {
    %c0_i32 = arith.constant 0 : i32
    %c0_i32_0 = arith.constant 0 : i32
    %c0_i32_1 = arith.constant 0 : i32
    return %c0_i32, %arg0, %c0_i32_0 : i32, i32, i32
  }
  func.func @transform_4(%arg0: i32, %arg1: memref<18xf32, #tpu.memory_space<smem>>) -> (i32, i32, i32) {
    %c0_i32 = arith.constant 0 : i32
    %c0_i32_0 = arith.constant 0 : i32
    %c0_i32_1 = arith.constant 0 : i32
    return %c0_i32, %arg0, %c0_i32_0 : i32, i32, i32
  }
  func.func @transform_5(%arg0: i32, %arg1: memref<18xf32, #tpu.memory_space<smem>>) -> (i32, i32, i32) {
    %c0_i32 = arith.constant 0 : i32
    %c0_i32_0 = arith.constant 0 : i32
    %c0_i32_1 = arith.constant 0 : i32
    return %c0_i32, %arg0, %c0_i32_0 : i32, i32, i32
  }
}

</mosaic_0001>

<bundles_post_ra>
// kernel: tpu_custom_call.1
= control target key start
LH: loop header
LB: loop body
LE: loop exit
PB: predicated region body
PF: predicated region fallthrough
CT: control target
= control target key end

     0   :  { %s1689_s24 = smov [#allocation5]   ;;  %s2703_s0 = inlined_call_operand.vmem [shape: f32[18], index: 0, kind: input, shape index: {}]   ;;  %s2704_s1 = inlined_call_operand.vmem [shape: f32[3,16,896], index: 1, kind: input, shape index: {}]   ;;  %s2705_s2 = inlined_call_operand.vmem [shape: f32[3,16,1], index: 2, kind: input, shape index: {}]   ;;  %s2706_s3 = inlined_call_operand.vmem [shape: f32[3,16,896], index: 3, kind: input, shape index: {}, may-alias: {3,5}]   ;;  %s2707_s4 = inlined_call_operand.vmem [shape: f32[3,16,1], index: 4, kind: input, shape index: {}, may-alias: {4,6}]   ;;  %s2708_s5 = inlined_call_operand.vmem [shape: f32[3,16,896], index: 5, kind: output, shape index: {0}, may-alias: {3,5}]   ;;  %s2709_s6 = inlined_call_operand.vmem [shape: f32[3,16,1], index: 6, kind: output, shape index: {1}, may-alias: {4,6}]  }
   0x1   :  { %s13_s23 = sshll.u32 %s2703_s0, 4  ;;  %s14_s23 = int_to_ptr.vmem [resolvable:$true] %s13_s23 }
   0x2   :  { %16 = dma.vmem_to_smem %s14_s23, 16, %s1689_s24, [#allocation4] }
   0x3   :  { %1671 = dma.done.wait [#allocation4], 16 }
   0x4   :  { %1672 = vsyncadd [#allocation4], 4294967280 }
   0x5   :  { %19 = sfence }
   0x6   :  { %s1730_s25 = smov 0   ;;  %s1732_s26 = smov 0  }
   0x7   :  { %s1734_s27 = smov 0  }
   0x8 LB: > { %s1746_s0 = sadd.s32 4294967295, %s1683_s27   ;;  %s1749_s28 = sadd.s32 1, %s1683_s27   ;;  %s1683_s27 = sphi %s1734_s27, %s2809_s27   ;;  %s1679_s26 = sphi %s1732_s26, %s2808_s26   ;;  %s1675_s25 = sphi %s1730_s25, %s2807_s25  }
   0x9   : > { %s29_s29 = ssub.s32 %s1683_s27, %s1749_s28  ;;  %s32_s30 = sadd.s32 1, %s1679_s26 }
   0xa   : > { %p30_p0 = scmp.eq.s32.totalorder %s29_s29, 0  ;;  %p39_p1 = scmp.ne.s32.totalorder %s1679_s26, %s1675_s25 }
   0xb   : > { %p40_p2 = scmp.eq.s32.totalorder %s1683_s27, 0  ;;  %p147_p3 = scmp.eq.s32.totalorder %s1746_s0, 1 }
   0xc   : > { %s1759_s7 = scalar_select %p30_p0, %s1679_s26, %s32_s30  }
   0xd   : > { %p1761_p4 = por %p40_p2, %p39_p1  ;;  %p1765_p5 = por %p147_p3, %p39_p1 }
   0xe   : > { %p1474_p6 = scmp.ge.s32.totalorder %s1683_s27, 2 }
  0x10   : > { %195 = sbr.rel (%p1474_p6) target bundleno = 87 (0x57), region = 16 }
  0x15   : > { %198 = sbr.rel (!%p1761_p4) target bundleno = 47 (0x2f), region = 20  ;;  %s200_s10 = sand.u32 (%p1761_p4), 1, %s1679_s26  }
  0x16   : > { %s1597_s11 = smul.u32 (%p1761_p4), 56, %s1683_s27 }
  0x17   : > { %s1596_s12 = smul.u32 (%p1761_p4), 168, %s200_s10 }
  0x18   : > { %s1777_s15 = scalar_lea.vmem (%p1761_p4), %s2704_s1, %s1597_s11 }
  0x19   : > { %v218_v0 = vld [vmem:[%s1777_s15] sm:$0xff] (%p1761_p4)  ;;  %v220_v1 = vld [vmem:[%s1777_s15 + $0x8] sm:$0xff] (%p1761_p4)  ;;  %v222_v2 = vld [vmem:[%s1777_s15 + $0x10] sm:$0xff] (%p1761_p4)  ;;  %s1782_s16 = scalar_lea.vmem (%p1761_p4), [#allocation6], %s1596_s12 }
  0x1a   : > { %219 = vst [vmem:[%s1782_s16] sm:$0xff] %v218_v0  ;;  %v224_v3 = vld [vmem:[%s1777_s15 + $0x18] sm:$0xff]  ;;  %v226_v4 = vld [vmem:[%s1777_s15 + $0x20] sm:$0xff]  ;;  %v228_v5 = vld [vmem:[%s1777_s15 + $0x28] sm:$0xff] }
  0x1b   : > { %221 = vst [vmem:[%s1782_s16 + $0x8] sm:$0xff] %v220_v1  ;;  %v230_v6 = vld [vmem:[%s1777_s15 + $0x30] sm:$0xff]  ;;  %v234_v8 = vld [vmem:[%s1777_s15 + $0x78] sm:$0xff]  ;;  %v236_v9 = vld [vmem:[%s1777_s15 + $0x80] sm:$0xff] }
  0x1c   : > { %223 = vst [vmem:[%s1782_s16 + $0x10] sm:$0xff] %v222_v2  ;;  %v232_v7 = vld [vmem:[%s1777_s15 + $0x70] sm:$0xff]  ;;  %v238_v10 = vld [vmem:[%s1777_s15 + $0x88] sm:$0xff]  ;;  %v242_v12 = vld [vmem:[%s1777_s15 + $0x98] sm:$0xff] }
  0x1d   : > { %225 = vst [vmem:[%s1782_s16 + $0x18] sm:$0xff] %v224_v3  ;;  %v240_v11 = vld [vmem:[%s1777_s15 + $0x90] sm:$0xff]  ;;  %v244_v13 = vld [vmem:[%s1777_s15 + $0xa0] sm:$0xff]  ;;  %v248_v15 = vld [vmem:[%s1777_s15 + $0xe8] sm:$0xff] }
  0x1e   : > { %227 = vst [vmem:[%s1782_s16 + $0x20] sm:$0xff] %v226_v4  ;;  %v246_v14 = vld [vmem:[%s1777_s15 + $0xe0] sm:$0xff]  ;;  %v250_v16 = vld [vmem:[%s1777_s15 + $0xf0] sm:$0xff]  ;;  %v252_v17 = vld [vmem:[%s1777_s15 + $0xf8] sm:$0xff] }
  0x1f   : > { %229 = vst [vmem:[%s1782_s16 + $0x28] sm:$0xff] %v228_v5  ;;  %v254_v18 = vld [vmem:[%s1777_s15 + $0x100] sm:$0xff]  ;;  %v256_v19 = vld [vmem:[%s1777_s15 + $0x108] sm:$0xff]  ;;  %v258_v20 = vld [vmem:[%s1777_s15 + $0x110] sm:$0xff] }
  0x20   : > { %231 = vst [vmem:[%s1782_s16 + $0x30] sm:$0xff] %v230_v6 }
  0x21   : > { %233 = vst [vmem:[%s1782_s16 + $0x38] sm:$0xff] %v232_v7 }
  0x22   : > { %235 = vst [vmem:[%s1782_s16 + $0x40] sm:$0xff] %v234_v8 }
  0x23   : > { %237 = vst [vmem:[%s1782_s16 + $0x48] sm:$0xff] %v236_v9 }
  0x24   : > { %239 = vst [vmem:[%s1782_s16 + $0x50] sm:$0xff] %v238_v10 }
  0x25   : > { %241 = vst [vmem:[%s1782_s16 + $0x58] sm:$0xff] %v240_v11 }
  0x26   : > { %243 = vst [vmem:[%s1782_s16 + $0x60] sm:$0xff] %v242_v12 }
  0x27   : > { %245 = vst [vmem:[%s1782_s16 + $0x68] sm:$0xff] %v244_v13 }
  0x28   : > { %247 = vst [vmem:[%s1782_s16 + $0x70] sm:$0xff] %v246_v14 }
  0x29   : > { %249 = vst [vmem:[%s1782_s16 + $0x78] sm:$0xff] %v248_v15 }
  0x2a   : > { %251 = vst [vmem:[%s1782_s16 + $0x80] sm:$0xff] %v250_v16 }
  0x2b   : > { %253 = vst [vmem:[%s1782_s16 + $0x88] sm:$0xff] %v252_v17 }
  0x2c   : > { %255 = vst [vmem:[%s1782_s16 + $0x90] sm:$0xff] %v254_v18 }
  0x2d   : > { %257 = vst [vmem:[%s1782_s16 + $0x98] sm:$0xff] %v256_v19 }
  0x2e   : > { %259 = vst [vmem:[%s1782_s16 + $0xa0] sm:$0xff] %v258_v20 }
  0x2f PF: > { %265 = sbr.rel (!%p1761_p4) target bundleno = 54 (0x36), region = 43  ;;  %s267_s17 = sand.u32 (%p1761_p4), 1, %s1679_s26  }
  0x30   : > { %s1476_s18 = sshll.u32 (%p1761_p4), %s1683_s27, 3  ;;  %s1598_s19 = smul.u32 (%p1761_p4), 24, %s267_s17 }
  0x31   : > { %s271_s22 = scalar_lea.vmem (%p1761_p4), %s2705_s2, %s1476_s18 }
  0x32   : > { %v304_v21 = vld [vmem:[%s271_s22] sm:$0xff] (%p1761_p4)  ;;  %v306_v22 = vld [vmem:[%s271_s22 + $0x10] sm:$0xff] (%p1761_p4)  ;;  %s269_s23 = scalar_lea.vmem (%p1761_p4), [#allocation7], %s1598_s19 }
  0x33   : > { %v308_v23 = vld [vmem:[%s271_s22 + $0x20] sm:$0xff] (%p1761_p4)  ;;  %305 = vst [vmem:[%s269_s23] sm:$0xff] (%p1761_p4), %v304_v21 }
  0x34   : > { %307 = vst [vmem:[%s269_s23 + $0x8] sm:$0xff] %v306_v22 }
  0x35   : > { %309 = vst [vmem:[%s269_s23 + $0x10] sm:$0xff] %v308_v23 }
  0x36 PF: > { %315 = sbr.rel (!%p1761_p4) target bundleno = 80 (0x50), region = 81  ;;  %s317_s24 = sand.u32 (%p1761_p4), 1, %s1679_s26  }
  0x37   : > { %s1600_s29 = smul.u32 (%p1761_p4), 56, %s1683_s27 }
  0x38   : > { %s1599_s30 = smul.u32 (%p1761_p4), 168, %s317_s24 }
  0x39   : > { %s1837_s12 = scalar_lea.vmem (%p1761_p4), %s2706_s3, %s1600_s29 }
  0x3a   : > { %v335_v24 = vld [vmem:[%s1837_s12] sm:$0xff] (%p1761_p4)  ;;  %v337_v25 = vld [vmem:[%s1837_s12 + $0x8] sm:$0xff] (%p1761_p4)  ;;  %v339_v26 = vld [vmem:[%s1837_s12 + $0x10] sm:$0xff] (%p1761_p4)  ;;  %s1842_s13 = scalar_lea.vmem (%p1761_p4), [#allocation8], %s1599_s30 }
  0x3b   : > { %336 = vst [vmem:[%s1842_s13] sm:$0xff] %v335_v24  ;;  %v341_v27 = vld [vmem:[%s1837_s12 + $0x18] sm:$0xff]  ;;  %v343_v28 = vld [vmem:[%s1837_s12 + $0x20] sm:$0xff]  ;;  %v345_v29 = vld [vmem:[%s1837_s12 + $0x28] sm:$0xff] }
  0x3c   : > { %338 = vst [vmem:[%s1842_s13 + $0x8] sm:$0xff] %v337_v25  ;;  %v347_v30 = vld [vmem:[%s1837_s12 + $0x30] sm:$0xff]  ;;  %v351_v32 = vld [vmem:[%s1837_s12 + $0x78] sm:$0xff]  ;;  %v353_v33 = vld [vmem:[%s1837_s12 + $0x80] sm:$0xff] }
  0x3d   : > { %340 = vst [vmem:[%s1842_s13 + $0x10] sm:$0xff] %v339_v26  ;;  %v349_v31 = vld [vmem:[%s1837_s12 + $0x70] sm:$0xff]  ;;  %v355_v34 = vld [vmem:[%s1837_s12 + $0x88] sm:$0xff]  ;;  %v359_v36 = vld [vmem:[%s1837_s12 + $0x98] sm:$0xff] }
  0x3e   : > { %342 = vst [vmem:[%s1842_s13 + $0x18] sm:$0xff] %v341_v27  ;;  %v357_v35 = vld [vmem:[%s1837_s12 + $0x90] sm:$0xff]  ;;  %v361_v37 = vld [vmem:[%s1837_s12 + $0xa0] sm:$0xff]  ;;  %v365_v39 = vld [vmem:[%s1837_s12 + $0xe8] sm:$0xff] }
  0x3f   : > { %344 = vst [vmem:[%s1842_s13 + $0x20] sm:$0xff] %v343_v28  ;;  %v363_v38 = vld [vmem:[%s1837_s12 + $0xe0] sm:$0xff]  ;;  %v367_v40 = vld [vmem:[%s1837_s12 + $0xf0] sm:$0xff]  ;;  %v369_v41 = vld [vmem:[%s1837_s12 + $0xf8] sm:$0xff] }
  0x40   : > { %346 = vst [vmem:[%s1842_s13 + $0x28] sm:$0xff] %v345_v29  ;;  %v371_v42 = vld [vmem:[%s1837_s12 + $0x100] sm:$0xff]  ;;  %v373_v43 = vld [vmem:[%s1837_s12 + $0x108] sm:$0xff]  ;;  %v375_v44 = vld [vmem:[%s1837_s12 + $0x110] sm:$0xff] }
  0x41   : > { %348 = vst [vmem:[%s1842_s13 + $0x30] sm:$0xff] %v347_v30 }
  0x42   : > { %350 = vst [vmem:[%s1842_s13 + $0x38] sm:$0xff] %v349_v31 }
  0x43   : > { %352 = vst [vmem:[%s1842_s13 + $0x40] sm:$0xff] %v351_v32 }
  0x44   : > { %354 = vst [vmem:[%s1842_s13 + $0x48] sm:$0xff] %v353_v33 }
  0x45   : > { %356 = vst [vmem:[%s1842_s13 + $0x50] sm:$0xff] %v355_v34 }
  0x46   : > { %358 = vst [vmem:[%s1842_s13 + $0x58] sm:$0xff] %v357_v35 }
  0x47   : > { %360 = vst [vmem:[%s1842_s13 + $0x60] sm:$0xff] %v359_v36 }
  0x48   : > { %362 = vst [vmem:[%s1842_s13 + $0x68] sm:$0xff] %v361_v37 }
  0x49   : > { %364 = vst [vmem:[%s1842_s13 + $0x70] sm:$0xff] %v363_v38 }
  0x4a   : > { %366 = vst [vmem:[%s1842_s13 + $0x78] sm:$0xff] %v365_v39 }
  0x4b   : > { %368 = vst [vmem:[%s1842_s13 + $0x80] sm:$0xff] %v367_v40 }
  0x4c   : > { %370 = vst [vmem:[%s1842_s13 + $0x88] sm:$0xff] %v369_v41 }
  0x4d   : > { %372 = vst [vmem:[%s1842_s13 + $0x90] sm:$0xff] %v371_v42 }
  0x4e   : > { %374 = vst [vmem:[%s1842_s13 + $0x98] sm:$0xff] %v373_v43 }
  0x4f   : > { %376 = vst [vmem:[%s1842_s13 + $0xa0] sm:$0xff] %v375_v44 }
  0x50 PF: > { %382 = sbr.rel (!%p1761_p4) target bundleno = 87 (0x57), region = 104  ;;  %s384_s14 = sand.u32 (%p1761_p4), 1, %s1679_s26  }
  0x51   : > { %s1478_s15 = sshll.u32 (%p1761_p4), %s1683_s27, 3  ;;  %s1601_s16 = smul.u32 (%p1761_p4), 24, %s384_s14 }
  0x52   : > { %s388_s19 = scalar_lea.vmem (%p1761_p4), %s2707_s4, %s1478_s15 }
  0x53   : > { %v421_v45 = vld [vmem:[%s388_s19] sm:$0xff] (%p1761_p4)  ;;  %v423_v46 = vld [vmem:[%s388_s19 + $0x10] sm:$0xff] (%p1761_p4)  ;;  %s386_s20 = scalar_lea.vmem (%p1761_p4), [#allocation9], %s1601_s16 }
  0x54   : > { %v425_v47 = vld [vmem:[%s388_s19 + $0x20] sm:$0xff] (%p1761_p4)  ;;  %422 = vst [vmem:[%s386_s20] sm:$0xff] (%p1761_p4), %v421_v45 }
  0x55   : > { %424 = vst [vmem:[%s386_s20 + $0x8] sm:$0xff] %v423_v46 }
  0x56   : > { %426 = vst [vmem:[%s386_s20 + $0x10] sm:$0xff] %v425_v47 }
  0x57 PF: > { %p1479_p7 = scmp.ge.s32.totalorder %s1683_s27, 1  ;;  %p431_p8 = scmp.lt.s32.totalorder %s1683_s27, 3 }
  0x59   : > { %p432_p9 = pnand %p1479_p7, %p431_p8 }
  0x5a   : > { %s438_s8 = sand.u32 (!%p432_p9), 1, %s1675_s25   ;;  %s1988_s10 = smov (!%p432_p9), 0  }
  0x5b   : > { %435 = sbr.rel (%p432_p9) target bundleno = 473 (0x1d9), region = 142 }
  0x5c   : > { %s1893_s21 = smul.u32 (!%p432_p9), 168, %s438_s8 }
  0x5d   : > { %s1896_s22 = smul.u32 (!%p432_p9), 24, %s438_s8 }
  0x5e   : > { %s1901_s23 = scalar_lea.vmem (!%p432_p9), [#allocation8], %s1893_s21  ;;  %s1908_s25 = scalar_lea.vmem (!%p432_p9), [#allocation10], %s1893_s21 }
  0x5f   : > { %s461_s27 = scalar_lea.vmem (!%p432_p9), [#allocation9], %s1896_s22  ;;  %s1951_s24 = scalar_lea.vmem (!%p432_p9), [#allocation11], %s1896_s22 }
  0x60   : > { %v1690_v48 = vmov 0.0   ;;  %v501_v49 = vld [vmem:[%s1901_s23] sm:$0xff]  ;;  %v502_v50 = vld [vmem:[%s1901_s23 + $0x8] sm:$0xff]  ;;  %v503_v51 = vld [vmem:[%s1901_s23 + $0x10] sm:$0xff]  ;;  %vm546_vm0 = vcmask 7168   ;;  %s1983_s29 = scalar_lea.vmem [#allocation6], %s1893_s21 }
  0x61   : > { %550 = vst [vmem:[#allocation2] sm:$0xff] %v1690_v48  ;;  %v504_v52 = vld [vmem:[%s1901_s23 + $0x18] sm:$0xff]  ;;  %v505_v53 = vld [vmem:[%s1901_s23 + $0x20] sm:$0xff]  ;;  %v506_v54 = vld [vmem:[%s1901_s23 + $0x28] sm:$0xff]  ;;  %s1986_s30 = scalar_lea.vmem [#allocation7], %s1896_s22 }
  0x62   : > { %551 = vst [vmem:[#allocation2 + $0x38] sm:$0xff] %v1690_v48  ;;  %v507_v55 = vld [vmem:[%s1901_s23 + $0x30] sm:$0xff]  ;;  %v508_v56 = vld [vmem:[%s1901_s23 + $0x38] sm:$0xff]  ;;  %v509_v57 = vld [vmem:[%s1901_s23 + $0x40] sm:$0xff] }
  0x63   : > { %552 = vst [vmem:[#allocation2 + $0x50] sm:$0xff] %v1690_v48  ;;  %v510_v58 = vld [vmem:[%s1901_s23 + $0x48] sm:$0xff]  ;;  %v511_v59 = vld [vmem:[%s1901_s23 + $0x50] sm:$0xff]  ;;  %v512_v60 = vld [vmem:[%s1901_s23 + $0x58] sm:$0xff] }
  0x64   : > { %553 = vst [vmem:[#allocation2 + $0x18] sm:$0xff] %v1690_v48  ;;  %v513_v61 = vld [vmem:[%s1901_s23 + $0x60] sm:$0xff]  ;;  %v514_v62 = vld [vmem:[%s1901_s23 + $0x68] sm:$0xff]  ;;  %v515_v63 = vld [vmem:[%s1901_s23 + $0x70] sm:$0xff] }
  0x65   : > { %522 = vst [vmem:[%s1908_s25] sm:$0xff] %v501_v49  ;;  %v516_v0 = vld [vmem:[%s1901_s23 + $0x78] sm:$0xff]  ;;  %v517_v1 = vld [vmem:[%s1901_s23 + $0x80] sm:$0xff]  ;;  %v518_v2 = vld [vmem:[%s1901_s23 + $0x88] sm:$0xff] }
  0x66   : > { %523 = vst [vmem:[%s1908_s25 + $0x8] sm:$0xff] %v502_v50  ;;  %v519_v3 = vld [vmem:[%s1901_s23 + $0x90] sm:$0xff]  ;;  %v520_v4 = vld [vmem:[%s1901_s23 + $0x98] sm:$0xff]  ;;  %v521_v5 = vld [vmem:[%s1901_s23 + $0xa0] sm:$0xff] }
  0x67   : > { %524 = vst [vmem:[%s1908_s25 + $0x10] sm:$0xff] %v503_v51  ;;  %v543_v6 = vld [vmem:[%s461_s27] sm:$0xff]  ;;  %v544_v7 = vld [vmem:[%s461_s27 + $0x8] sm:$0xff]  ;;  %v545_v8 = vld [vmem:[%s461_s27 + $0x10] sm:$0xff] }
  0x68   : > { %525 = vst [vmem:[%s1908_s25 + $0x18] sm:$0xff] %v504_v52 }
  0x69   : > { %526 = vst [vmem:[%s1908_s25 + $0x20] sm:$0xff] %v505_v53 }
  0x6a   : > { %527 = vst [vmem:[%s1908_s25 + $0x28] sm:$0xff] %v506_v54 }
  0x6b   : > { %528 = vst [vmem:[%s1908_s25 + $0x30] sm:$0xff] %v507_v55 }
  0x6c   : > { %529 = vst [vmem:[%s1908_s25 + $0x38] sm:$0xff] %v508_v56 }
  0x6d   : > { %530 = vst [vmem:[%s1908_s25 + $0x40] sm:$0xff] %v509_v57 }
  0x6e   : > { %531 = vst [vmem:[%s1908_s25 + $0x48] sm:$0xff] %v510_v58 }
  0x6f   : > { %532 = vst [vmem:[%s1908_s25 + $0x50] sm:$0xff] %v511_v59 }
  0x70   : > { %533 = vst [vmem:[%s1908_s25 + $0x58] sm:$0xff] %v512_v60 }
  0x71   : > { %534 = vst [vmem:[%s1908_s25 + $0x60] sm:$0xff] %v513_v61 }
  0x72   : > { %535 = vst [vmem:[%s1908_s25 + $0x68] sm:$0xff] %v514_v62 }
  0x73   : > { %536 = vst [vmem:[%s1908_s25 + $0x70] sm:$0xff] %v515_v63 }
  0x74   : > { %537 = vst [vmem:[%s1908_s25 + $0x78] sm:$0xff] %v516_v0 }
  0x75   : > { %538 = vst [vmem:[%s1908_s25 + $0x80] sm:$0xff] %v517_v1 }
  0x76   : > { %539 = vst [vmem:[%s1908_s25 + $0x88] sm:$0xff] %v518_v2 }
  0x77   : > { %540 = vst [vmem:[%s1908_s25 + $0x90] sm:$0xff] %v519_v3 }
  0x78   : > { %541 = vst [vmem:[%s1908_s25 + $0x98] sm:$0xff] %v520_v4 }
  0x79   : > { %542 = vst [vmem:[%s1908_s25 + $0xa0] sm:$0xff] %v521_v5 }
  0x7a   : > { %547 = vst.msk [vmem:[%s1951_s24] sm:$0xff] %vm546_vm0, %v543_v6 }
  0x7b   : > { %548 = vst.msk [vmem:[%s1951_s24 + $0x8] sm:$0xff] %vm546_vm0, %v544_v7 }
  0x7c   : > { %549 = vst.msk [vmem:[%s1951_s24 + $0x10] sm:$0xff] %vm546_vm0, %v545_v8 }
  0x7d   : > { %554 = vst [vmem:[#allocation2 + $0x30] sm:$0xff] %v1690_v48 }
  0x7e   : > { %555 = vst [vmem:[#allocation2 + $0x68] sm:$0xff] %v1690_v48 }
  0x7f   : > { %556 = vst [vmem:[#allocation2 + $0x78] sm:$0xff] %v1690_v48 }
  0x80   : > { %557 = vst [vmem:[#allocation2 + $0x80] sm:$0xff] %v1690_v48 }
  0x81   : > { %558 = vst [vmem:[#allocation2 + $0x8] sm:$0xff] %v1690_v48 }
  0x82   : > { %559 = vst [vmem:[#allocation2 + $0x88] sm:$0xff] %v1690_v48 }
  0x83   : > { %560 = vst [vmem:[#allocation2 + $0x28] sm:$0xff] %v1690_v48 }
  0x84   : > { %561 = vst [vmem:[#allocation2 + $0x40] sm:$0xff] %v1690_v48 }
  0x85   : > { %562 = vst [vmem:[#allocation2 + $0x60] sm:$0xff] %v1690_v48 }
  0x86   : > { %563 = vst [vmem:[#allocation2 + $0x90] sm:$0xff] %v1690_v48 }
  0x87   : > { %564 = vst [vmem:[#allocation2 + $0x98] sm:$0xff] %v1690_v48 }
  0x88   : > { %565 = vst [vmem:[#allocation2 + $0x58] sm:$0xff] %v1690_v48 }
  0x89   : > { %566 = vst [vmem:[#allocation2 + $0x20] sm:$0xff] %v1690_v48 }
  0x8a   : > { %567 = vst [vmem:[#allocation2 + $0x48] sm:$0xff] %v1690_v48 }
  0x8b   : > { %568 = vst [vmem:[#allocation2 + $0x70] sm:$0xff] %v1690_v48 }
  0x8c   : > { %569 = vst [vmem:[#allocation2 + $0x10] sm:$0xff] %v1690_v48 }
  0x8d   : > { %570 = vst [vmem:[#allocation2 + $0xa0] sm:$0xff] %v1690_v48 }
  0x8e   : > { %571 = vst.msk [vmem:[#allocation3] sm:$0xff] %vm546_vm0, %v1690_v48 }
  0x8f   : > { %572 = vst.msk [vmem:[#allocation3 + $0x8] sm:$0xff] %vm546_vm0, %v1690_v48 }
  0x90   : > { %573 = vst.msk [vmem:[#allocation3 + $0x10] sm:$0xff] %vm546_vm0, %v1690_v48 }
  0x91 LB: >> { %v1994_v9 = vld [vmem:[%s1983_s29] sm:$0xff]  ;;  %v1997_v10 = vld [vmem:[%s1983_s29 + $0x8] sm:$0xff]  ;;  %v2000_v11 = vld [vmem:[%s1983_s29 + $0x10] sm:$0xff]  ;;  %s2162_s11 = smul.u32 6, %s1687_s10  ;;  %s579_s10 = sadd.s32 1, %s1687_s10   ;;  %s1687_s10 = sphi %s1988_s10, %s579_s10  }
  0x92   : >> { %v2003_v12 = vld [vmem:[%s1983_s29 + $0x18] sm:$0xff]  ;;  %v2006_v13 = vld [vmem:[%s1908_s25] sm:$0xff]  ;;  %v2009_v14 = vld [vmem:[%s1908_s25 + $0x8] sm:$0xff]  ;;  %p576_p10 = scmp.ge.s32.totalorder %s579_s10, 3  }
  0x93   : >> { %2740 = vst [vmem:[#allocation13_spill] sm:$0xff] %v2003_v12  ;;  %v2012_v15 = vld [vmem:[%s1908_s25 + $0x10] sm:$0xff]  ;;  %v2015_v16 = vld [vmem:[%s1908_s25 + $0x18] sm:$0xff]  ;;  %v617_v17 = vmul.f32 %v2006_v13, %v1994_v9  ;;  %v618_v18 = vmul.f32 %v2009_v14, %v1997_v10  ;;  %v2022_v19 = vld [vmem:[%s1983_s29 + $0x20] sm:$0xff]  ;;  %s584_s12 = sadd.s32 2, %s2162_s11  ;;  %s590_s13 = sadd.s32 5, %s2162_s11 }
  0x94   : >> { %2741 = vst [vmem:[#allocation14_spill] sm:$0xff] %v2022_v19  ;;  %v2025_v20 = vld [vmem:[%s1908_s25 + $0x20] sm:$0xff]  ;;  %v619_v21 = vmul.f32 %v2012_v15, %v2000_v11  ;;  %v620_v22 = vmul.f32 %v2015_v16, %v2003_v12  ;;  %v2032_v24 = vld [vmem:[%s1983_s29 + $0x70] sm:$0xff]  ;;  %v2035_v25 = vld [vmem:[%s1983_s29 + $0x78] sm:$0xff]  ;;  %s585_s14 = sld [smem:[#allocation5 + %s584_s12]]  ;;  %s582_s16 = sadd.s32 1, %s2162_s11 }
  0x95   : >> { %v624_v23 = vadd.f32 %v618_v18, %v617_v17  ;;  %v2038_v26 = vld [vmem:[%s1983_s29 + $0x80] sm:$0xff]  ;;  %v2041_v27 = vld [vmem:[%s1983_s29 + $0x28] sm:$0xff]  ;;  %v621_v30 = vmul.f32 %v2025_v20, %v2022_v19  ;;  %v2052_v32 = vld [vmem:[%s1908_s25 + $0x70] sm:$0xff]  ;;  %s2166_s15 = sld [smem:[#allocation5 + %s590_s13]]  ;;  %s588_s22 = sadd.s32 4, %s2162_s11 }
  0x96   : >> { %2742 = vst [vmem:[#allocation15_spill] sm:$0xff] %v2041_v27  ;;  %v2044_v28 = vld [vmem:[%s1908_s25 + $0x28] sm:$0xff]  ;;  %v2055_v33 = vld [vmem:[%s1908_s25 + $0x78] sm:$0xff]  ;;  %v2058_v34 = vld [vmem:[%s1908_s25 + $0x80] sm:$0xff]  ;;  %v749_v38 = vmul.f32 %v2052_v32, %v2032_v24  ;;  %s2172_s18 = sld [smem:[#allocation5 + %s582_s16]]  ;;  %s586_s13 = sadd.s32 3, %s2162_s11 }
  0x97   : >> { %v2047_v29 = vld [vmem:[%s1983_s29 + $0x88] sm:$0xff]  ;;  %v625_v31 = vadd.f32 %v624_v23, %v619_v21  ;;  %v2061_v35 = vld [vmem:[%s1983_s29 + $0x30] sm:$0xff]  ;;  %v750_v39 = vmul.f32 %v2055_v33, %v2035_v25  ;;  %v751_v40 = vmul.f32 %v2058_v34, %v2038_v26  ;;  %v622_v41 = vmul.f32 %v2044_v28, %v2041_v27  ;;  %v2078_v43 = vld [vmem:[%s1983_s29 + $0x38] sm:$0xff]  ;;  %s589_s23 = sld [smem:[#allocation5 + %s588_s22]] }
  0x98   : >> { %2743 = vst [vmem:[#allocation16_spill] sm:$0xff] %v2061_v35  ;;  %v2064_v36 = vld [vmem:[%s1908_s25 + $0x30] sm:$0xff]  ;;  %v2067_v37 = vld [vmem:[%s1908_s25 + $0x88] sm:$0xff]  ;;  %v2089_v48 = vld [vmem:[%s1983_s29 + $0x40] sm:$0xff]  ;;  %s581_s12 = sld [smem:[#allocation5 + %s2162_s11]] }
  0x99   : >> { %v626_v42 = vadd.f32 %v625_v31, %v620_v22  ;;  %v2081_v44 = vld [vmem:[%s1983_s29 + $0x90] sm:$0xff]  ;;  %v752_v46 = vmul.f32 %v2067_v37, %v2047_v29  ;;  %v756_v47 = vadd.f32 %v750_v39, %v749_v38  ;;  %v623_v49 = vmul.f32 %v2064_v36, %v2061_v35  ;;  %v2094_v51 = vld [vmem:[%s1983_s29 + $0x98] sm:$0xff]  ;;  %v2103_v55 = vld [vmem:[%s1983_s29 + $0x48] sm:$0xff] }
  0x9a   : >> { %v2084_v45 = vld [vmem:[%s1908_s25 + $0x90] sm:$0xff]  ;;  %v2097_v52 = vld [vmem:[%s1908_s25 + $0x98] sm:$0xff]  ;;  %v2106_v56 = vld [vmem:[%s1908_s25 + $0x40] sm:$0xff] }
  0x9b   : >> { %v627_v50 = vadd.f32 %v626_v42, %v621_v30  ;;  %v2100_v53 = vld [vmem:[%s1908_s25 + $0x38] sm:$0xff]  ;;  %v757_v54 = vadd.f32 %v756_v47, %v751_v40  ;;  %v2109_v57 = vld [vmem:[%s1908_s25 + $0x48] sm:$0xff]  ;;  %v2114_v60 = vld [vmem:[%s1983_s29 + $0xa0] sm:$0xff]  ;;  %v753_v61 = vmul.f32 %v2084_v45, %v2081_v44  ;;  %v889_v62 = vmul.f32 %v2106_v56, %v2089_v48  ;;  %s2170_s17 = smul.f32 %s2166_s15, %s585_s14  ;;  %s2210_s14 = sld [smem:[#allocation5 + %s586_s13]] }
  0x9c   : >> { %v888_v58 = vmul.f32 %v2100_v53, %v2078_v43  ;;  %v2121_v63 = vld [vmem:[%s1908_s25 + $0xa0] sm:$0xff]  ;;  %v2124_v1 = vld [vmem:[%s1983_s29 + $0x50] sm:$0xff]  ;;  %v754_v4 = vmul.f32 %v2097_v52, %v2094_v51  ;;  %v890_v5 = vmul.f32 %v2109_v57, %v2103_v55  ;;  %v2134_v7 = vld [vmem:[%s1983_s29 + $0x58] sm:$0xff]  ;;  %s981_s21 = smul.f32 2.0, %s2166_s15 }
  0x9d   : >> { %v628_v59 = vadd.f32 %v627_v50, %v622_v41  ;;  %v758_v0 = vadd.f32 %v757_v54, %v752_v46  ;;  %v2127_v2 = vld [vmem:[%s1908_s25 + $0x50] sm:$0xff]  ;;  %v2137_v8 = vld [vmem:[%s1908_s25 + $0x58] sm:$0xff]  ;;  %v755_v17 = vmul.f32 %v2121_v63, %v2114_v60  ;;  %v2144_v22 = vld [vmem:[%s1983_s29 + $0x60] sm:$0xff]  ;;  %s703_s19 = ssub.f32 1.0, %s2170_s17  ;;  %s975_s20 = smul.f32 2.0, %s2170_s17 }
  0x9e   : >> { %v895_v6 = vadd.f32 %v889_v62, %v888_v58  ;;  %v891_v21 = vmul.f32 %v2127_v2, %v2124_v1  ;;  %v2147_v23 = vld [vmem:[%s1908_s25 + $0x60] sm:$0xff]  ;;  %v892_v31 = vmul.f32 %v2137_v8, %v2134_v7  ;;  %v2152_v39 = vld [vmem:[%s1983_s29 + $0x68] sm:$0xff]  ;;  %v1691_v58 = vmov 0   ;;  %s1139_s27 = smul.f32 2.0, %s589_s23 }
  0x9f   : >> { %v629_v3 = vadd.f32 %v628_v59, %v623_v49  ;;  %v759_v18 = vadd.f32 %v758_v0, %v753_v61  ;;  %v2155_v40 = vld [vmem:[%s1908_s25 + $0x68] sm:$0xff]  ;;  %v893_v42 = vmul.f32 %v2147_v23, %v2144_v22  ;;  %1640 = vset.pattern.permute.xlu1 %v1691_v58  ;;  %1641 = vset.pattern.permute.xlu2 %v1691_v58  ;;  %v606_v59 = vld [vmem:[%s1951_s24] sm:$0xff]  ;;  %v704_v0 = vstv %s703_s19  ;;  %s976_s8 = ssub.f32 1.0, %s975_s20  ;;  %s937_s11 = smul.f32 2.0, %s2172_s18 }
  0xa0   : >> { %v896_v38 = vadd.f32 %v895_v6, %v890_v5  ;;  %v894_v47 = vmul.f32 %v2155_v40, %v2152_v39  ;;  %1642 = vset.pattern.permute.xlu0 %v1691_v58  ;;  %v633_v61 = vld [vmem:[%s1986_s30] sm:$0xff]  ;;  %v706_v5 = vstv %s2166_s15  ;;  %v2181_v6 = vstv %s2172_s18  ;;  %v1543_v35 = vld [vmem:[%s1986_s30 + $0x8] sm:$0xff]  ;;  %s635_s15 = smul.f32 %s2172_s18, %s581_s12 }
  0xa1   : >> { %630 = vadd.xlane.f32.xlu0 %v629_v3  ;;  %v760_v30 = vadd.f32 %v759_v18, %v754_v4  ;;  %v2177_v4 = vld [vmem:[#allocation3] sm:$0xff]  ;;  %v705_v18 = vmul.f32 %v704_v0, %v606_v59  ;;  %s1094_s18 = smul.f32 2.0, %s2210_s14 }
  0xa2   : >> { %v897_v46 = vadd.f32 %v896_v38, %v891_v21  ;;  %v1487_v21 = vld [vmem:[%s1951_s24 + $0x8] sm:$0xff]  ;;  %v710_v38 = vmul.f32 %v2177_v4, %v706_v5  ;;  %s636_s16 = ssub.f32 1.0, %s635_s15 }
  0xa3   : >> { %v761_v41 = vadd.f32 %v760_v30, %v755_v17  ;;  %v712_v30 = vstv %s2170_s17  ;;  %s907_s17 = smul.f32 2.0, %s635_s15 }
  0xa4   : >> { %v898_v49 = vadd.f32 %v897_v46, %v892_v31 }
  0xa5   : >> { %s908_s19 = ssub.f32 1.0, %s907_s17 }
  0xa6   : >> { %v899_v50 = vadd.f32 %v898_v49, %v893_v42  ;;  %v1502_v42 = vld [vmem:[%s1951_s24 + $0x10] sm:$0xff] }
  0xa7   : >> { %v1511_v49 = vld [vmem:[%s1986_s30 + $0x10] sm:$0xff] }
  0xa8   : >> { %v900_v54 = vadd.f32 %v899_v50, %v894_v47  ;;  %v713_v47 = vmul.f32 %v1487_v21, %v712_v30 }
  0xa9   : >> { %762 = vadd.xlane.f32.xlu0 %v761_v41 }
  0xaa   : >> { %901 = vadd.xlane.f32.xlu1 %v900_v54 }
 0x114   : >> { %v631_v62 = vpop.xlane.xlu0 %630 }
 0x115   : >> { %v632_v3 = vadd.f32 %v631_v62, %v606_v59 }
 0x117   : >> { %v634_v17 = vsub.f32 %v632_v3, %v633_v61  ;;  %v835_v61 = vld [vmem:[#allocation3 + $0x10] sm:$0xff]  ;;  %v831_v3 = vmul.f32 %v1502_v42, %v704_v0 }
 0x118   : >> { %v836_v19 = vmul.f32 %v835_v61, %v706_v5 }
 0x119   : >> { %v707_v31 = vmul.f32 %v706_v5, %v634_v17  ;;  %v646_v41 = vmul.f32 %v2181_v6, %v634_v17 }
 0x11b   : >> { %v708_v46 = vsub.f32 %v705_v18, %v707_v31  ;;  %649 = vperm.xlu1 %1640, %v646_v41  }
 0x11c   : >> { %v763_v50 = vpop.xlane.xlu0 %762 }
 0x11d   : >> { %v711_v54 = vsub.f32 %v708_v46, %v710_v38  ;;  %v764_v58 = vadd.f32 %v1502_v42, %v763_v50  ;;  %v902_v27 = vpop.xlane.xlu1 %901 }
 0x11e   : >> { %v903_v18 = vadd.f32 %v1487_v21, %v902_v27 }
 0x11f   : >> { %v714_v59 = vadd.f32 %v713_v47, %v711_v54  ;;  %v767_v62 = vsub.f32 %v764_v58, %v1511_v49  ;;  %v977_v49 = vstv %s976_s8  ;;  %v983_v54 = vld [vmem:[#allocation3 + $0x8] sm:$0xff]  ;;  %v984_v58 = vstv %s981_s21 }
 0x120   : >> { %v906_v41 = vsub.f32 %v903_v18, %v1543_v35  ;;  %v978_v50 = vmul.f32 %v1487_v21, %v977_v49  ;;  %v985_v35 = vmul.f32 %v984_v58, %v983_v54 }
 0x121   : >> { %722 = vst.msk [vmem:[%s1951_s24] sm:$0xff] %vm546_vm0, %v714_v59  ;;  %v832_v17 = vmul.f32 %v767_v62, %v706_v5  ;;  %v775_v31 = vmul.f32 %v767_v62, %v2181_v6 }
 0x122   : >> { %v917_v42 = vmul.f32 %v906_v41, %v2181_v6  ;;  %v979_v27 = vmul.f32 %v906_v41, %v706_v5 }
 0x123   : >> { %v833_v38 = vsub.f32 %v831_v3, %v832_v17  ;;  %778 = vperm.xlu2 %1641, %v775_v31   ;;  %v1057_v31 = vstv %s589_s23 }
 0x124   : >> { %v980_v59 = vsub.f32 %v978_v50, %v979_v27 }
 0x125   : >> { %v837_v46 = vsub.f32 %v833_v38, %v836_v19  ;;  %v1141_v38 = vstv %s1139_s27 }
 0x126   : >> { %v986_v17 = vsub.f32 %v980_v59, %v985_v35  ;;  %v2220_v35 = vld [vmem:[#allocation2 + $0x98] sm:$0xff] }
 0x127   : >> { %v839_v0 = vadd.f32 %v837_v46, %v713_v47  ;;  %2745 = vst [vmem:[#allocation18_spill] sm:$0xff] %v2220_v35 }
 0x128   : >> { %v871_v19 = vld [vmem:[%s1951_s24] sm:$0xff] }
 0x129   : >> { %1519 = vst.msk [vmem:[%s1951_s24 + $0x10] sm:$0xff] %vm546_vm0, %v839_v0  ;;  %v1058_v5 = vmul.f32 %v1057_v31, %v871_v19 }
 0x12b   : >> { %920 = vperm.xlu2 %1641, %v917_v42   ;;  %v1059_v49 = vadd.f32 %v1058_v5, %v2177_v4  ;;  %v2213_v4 = vstv %s636_s16  ;;  %v2256_v5 = vld [vmem:[#allocation2 + $0x10] sm:$0xff] }
 0x12c   : >> { %2755 = vst [vmem:[#allocation28_spill] sm:$0xff] %v2256_v5 }
 0x130   : >> { %v1542_v62 = vld [vmem:[%s1951_s24 + $0x10] sm:$0xff] }
 0x131   : >> { %v887_v3 = vadd.f32 %v1542_v62, %v871_v19  ;;  %v1206_v21 = vmul.f32 %v1542_v62, %v1057_v31  ;;  %v2224_v19 = vmul.f32 %v2213_v4, %v2012_v15  ;;  %v2228_v62 = vmul.f32 %v2213_v4, %v2015_v16 }
 0x132   : >> { %v2246_v15 = vmul.f32 %v2213_v4, %v2064_v36  ;;  %v768_v16 = vmul.f32 %v2052_v32, %v2213_v4  ;;  %v772_v36 = vmul.f32 %v2084_v45, %v2213_v4  ;;  %v773_v32 = vmul.f32 %v2097_v52, %v2213_v4 }
 0x133   : >> { %v987_v47 = vmul.f32 %v887_v3, %v712_v30  ;;  %v1207_v41 = vadd.f32 %v1206_v21, %v835_v61  ;;  %v1144_v30 = vmul.f32 %v1057_v31, %v887_v3  ;;  %v2215_v61 = vstv %s635_s15  ;;  %2746 = vst [vmem:[#allocation19_spill] sm:$0xff] %v2224_v19  ;;  %v2254_v21 = vld [vmem:[#allocation2 + $0x70] sm:$0xff] }
 0x134   : >> { %2747 = vst [vmem:[#allocation20_spill] sm:$0xff] %v2228_v62  ;;  %v2232_v3 = vmul.f32 %v2213_v4, %v2025_v20  ;;  %v769_v20 = vmul.f32 %v2055_v33, %v2213_v4  ;;  %v774_v33 = vmul.f32 %v2121_v63, %v2213_v4  ;;  %v807_v52 = vmul.f32 %v2254_v21, %v2181_v6 }
 0x135   : >> { %v988_v18 = vadd.f32 %v987_v47, %v986_v17  ;;  %v2236_v17 = vmul.f32 %v2213_v4, %v2044_v28  ;;  %v2238_v47 = vld [vmem:[#allocation2 + $0x58] sm:$0xff]  ;;  %2753 = vst [vmem:[#allocation26_spill] sm:$0xff] %v2246_v15  ;;  %v770_v28 = vmul.f32 %v2058_v34, %v2213_v4  ;;  %v803_v34 = vmul.f32 %v2220_v35, %v2181_v6 }
 0x136   : >> { %2748 = vst [vmem:[#allocation21_spill] sm:$0xff] %v2232_v3  ;;  %v808_v63 = vmul.f32 %v2256_v5, %v2181_v6  ;;  %v2309_v35 = vmul.f32 %v2137_v8, %v2215_v61  ;;  %v2318_v12 = vmul.f32 %v2155_v40, %v2215_v61 }
 0x137   : >> { %1551 = vst.msk [vmem:[%s1951_s24 + $0x8] sm:$0xff] %vm546_vm0, %v988_v18  ;;  %v2240_v18 = vld [vmem:[#allocation2 + $0x20] sm:$0xff] }
 0x138   : >> { %2749 = vst [vmem:[#allocation22_spill] sm:$0xff] %v2236_v17 }
 0x139   : >> { %2750 = vst [vmem:[#allocation23_spill] sm:$0xff] %v2238_v47 }
 0x13a   : >> { %2751 = vst [vmem:[#allocation24_spill] sm:$0xff] %v2240_v18 }
 0x13b   : >> { %2754 = vst [vmem:[#allocation27_spill] sm:$0xff] %v2254_v21 }
 0x13e   : >> { %v1559_v46 = vld [vmem:[%s1951_s24 + $0x8] sm:$0xff] }
 0x13f   : >> { %v1060_v0 = vmul.f32 %v1559_v46, %v1057_v31  ;;  %v1142_v42 = vmul.f32 %v1559_v46, %v1141_v38  ;;  %v2242_v31 = vld [vmem:[#allocation2 + $0x48] sm:$0xff]  ;;  %v2258_v38 = vld [vmem:[#allocation2 + $0xa0] sm:$0xff]  ;;  %v2268_v46 = vstv %s908_s19 }
 0x140   : >> { %2752 = vst [vmem:[#allocation25_spill] sm:$0xff] %v2242_v31  ;;  %v806_v45 = vmul.f32 %v2242_v31, %v2181_v6 }
 0x141   : >> { %v1061_v50 = vsub.f32 %v1059_v49, %v1060_v0  ;;  %v1143_v27 = vadd.f32 %v1142_v42, %v983_v54  ;;  %v1209_v58 = vsub.f32 %v1207_v41, %v1060_v0  ;;  %v2218_v54 = vstv %s2210_s14  ;;  %2756 = vst [vmem:[#allocation29_spill] sm:$0xff] %v2258_v38 }
 0x142   : >> { %2744 = vst [vmem:[#allocation17_spill] sm:$0xff] %v2218_v54  ;;  %v771_v41 = vmul.f32 %v2067_v37, %v2213_v4  ;;  %v804_v49 = vmul.f32 %v2238_v47, %v2181_v6  ;;  %v805_v37 = vmul.f32 %v2240_v18, %v2181_v6  ;;  %v809_v0 = vmul.f32 %v2258_v38, %v2181_v6 }
 0x143   : >> { %1062 = vst.msk [vmem:[#allocation3] sm:$0xff] %vm546_vm0, %v1061_v50  ;;  %v1145_v59 = vsub.f32 %v1143_v27, %v1144_v30  ;;  %v2286_v50 = vmul.f32 %v2100_v53, %v2215_v61  ;;  %v2290_v27 = vmul.f32 %v2106_v56, %v2215_v61  ;;  %v2294_v30 = vmul.f32 %v2109_v57, %v2215_v61 }
 0x144   : >> { %1210 = vst.msk [vmem:[#allocation3 + $0x10] sm:$0xff] %vm546_vm0, %v1209_v58  ;;  %v2298_v58 = vmul.f32 %v2127_v2, %v2215_v61 }
 0x145   : >> { %1146 = vst.msk [vmem:[#allocation3 + $0x8] sm:$0xff] %vm546_vm0, %v1145_v59 }
 0x17d   : >> { %v779_v42 = vpop.permute.xlu2 %778 }
 0x17e   : >> { %v781_v59 = vmul.f32 %v2032_v24, %v779_v42  ;;  %v782_v38 = vmul.f32 %v2035_v25, %v779_v42  ;;  %v783_v5 = vmul.f32 %v2038_v26, %v779_v42  ;;  %v784_v21 = vmul.f32 %v2047_v29, %v779_v42 }
 0x17f   : >> { %v785_v31 = vmul.f32 %v2081_v44, %v779_v42  ;;  %v786_v18 = vmul.f32 %v2094_v51, %v779_v42  ;;  %v787_v47 = vmul.f32 %v2114_v60, %v779_v42  ;;  %v2314_v29 = vmul.f32 %v2147_v23, %v2215_v61 }
 0x180   : >> { %v788_v54 = vsub.f32 %v768_v16, %v781_v59  ;;  %v789_v15 = vsub.f32 %v769_v20, %v782_v38  ;;  %v790_v24 = vsub.f32 %v770_v28, %v783_v5  ;;  %v791_v17 = vsub.f32 %v771_v41, %v784_v21  ;;  %v2348_v21 = vld [vmem:[#allocation2 + $0x88] sm:$0xff]  ;;  %v2352_v38 = vld [vmem:[#allocation2 + $0x40] sm:$0xff] }
 0x181   : >> { %v792_v25 = vsub.f32 %v772_v36, %v785_v31  ;;  %v793_v3 = vsub.f32 %v773_v32, %v786_v18  ;;  %v794_v26 = vsub.f32 %v774_v33, %v787_v47  ;;  %v946_v16 = vstv %s937_s11  ;;  %v2329_v31 = vld [vmem:[#allocation2 + $0x80] sm:$0xff]  ;;  %2759 = vst [vmem:[#allocation32_spill] sm:$0xff] %v2348_v21  ;;  %v2350_v5 = vld [vmem:[#allocation2 + $0x28] sm:$0xff]  ;;  %v2369_v36 = vld [vmem:[#allocation2 + $0x90] sm:$0xff] }
 0x182   : >> { %v810_v44 = vsub.f32 %v788_v54, %v803_v34  ;;  %v811_v51 = vsub.f32 %v789_v15, %v804_v49  ;;  %v812_v62 = vsub.f32 %v790_v24, %v805_v37  ;;  %v813_v60 = vsub.f32 %v791_v17, %v806_v45  ;;  %2757 = vst [vmem:[#allocation30_spill] sm:$0xff] %v2329_v31  ;;  %v2331_v17 = vld [vmem:[#allocation2 + $0x8] sm:$0xff]  ;;  %v2367_v41 = vld [vmem:[#allocation2 + $0x60] sm:$0xff]  ;;  %v2410_v24 = vld [vmem:[#allocation2 + $0x50] sm:$0xff] }
 0x183   : >> { %v814_v42 = vsub.f32 %v792_v25, %v807_v52  ;;  %v815_v19 = vsub.f32 %v793_v3, %v808_v63  ;;  %v816_v20 = vsub.f32 %v794_v26, %v809_v0  ;;  %2758 = vst [vmem:[#allocation31_spill] sm:$0xff] %v2331_v17  ;;  %v2335_v3 = vmul.f32 %v2109_v57, %v2268_v46  ;;  %v2396_v52 = vld [vmem:[#allocation2] sm:$0xff]  ;;  %v2398_v63 = vld [vmem:[#allocation2 + $0x38] sm:$0xff]  ;;  %v2414_v26 = vld [vmem:[#allocation2 + $0x30] sm:$0xff] }
 0x184   : >> { %v2321_v18 = vadd.f32 %v2286_v50, %v810_v44  ;;  %v2324_v47 = vadd.f32 %v2290_v27, %v811_v51  ;;  %v2327_v54 = vadd.f32 %v2294_v30, %v812_v62  ;;  %v2339_v15 = vmul.f32 %v2127_v2, %v2268_v46  ;;  %2760 = vst [vmem:[#allocation33_spill] sm:$0xff] %v2350_v5  ;;  %v2412_v25 = vld [vmem:[#allocation2 + $0x18] sm:$0xff] }
 0x185   : >> { %v2343_v28 = vmul.f32 %v2137_v8, %v2268_v46  ;;  %v2346_v62 = vadd.f32 %v2298_v58, %v813_v60  ;;  %2761 = vst [vmem:[#allocation34_spill] sm:$0xff] %v2352_v38  ;;  %v2356_v57 = vmul.f32 %v2147_v23, %v2268_v46  ;;  %v2360_v2 = vmul.f32 %v2155_v40, %v2268_v46  ;;  %v921_v32 = vpop.permute.xlu2 %920 }
 0x186   : >> { %v2363_v8 = vadd.f32 %v2309_v35, %v814_v42  ;;  %1512 = vst [vmem:[%s1908_s25 + $0x70] sm:$0xff] %v2321_v18  ;;  %v910_v33 = vmul.f32 %v2100_v53, %v2268_v46  ;;  %v2374_v23 = vadd.f32 %v2314_v29, %v815_v19  ;;  %v947_v40 = vmul.f32 %v946_v16, %v2329_v31  ;;  %v2428_v42 = vld [vmem:[#allocation2 + $0x78] sm:$0xff] }
 0x187   : >> { %2762 = vst [vmem:[#allocation35_spill] sm:$0xff] %v2360_v2  ;;  %v948_v34 = vmul.f32 %v946_v16, %v2331_v17  ;;  %v911_v49 = vmul.f32 %v2106_v56, %v2268_v46  ;;  %v2383_v37 = vadd.f32 %v2318_v12, %v816_v20  ;;  %v2388_v53 = vmul.f32 %v946_v16, %v2348_v21 }
 0x188   : >> { %2763 = vst [vmem:[#allocation36_spill] sm:$0xff] %v2367_v41  ;;  %v2391_v19 = vmul.f32 %v946_v16, %v2350_v5  ;;  %v2394_v45 = vmul.f32 %v946_v16, %v2352_v38  ;;  %v2403_v56 = vmul.f32 %v946_v16, %v2367_v41  ;;  %v2406_v46 = vmul.f32 %v946_v16, %v2369_v36 }
 0x189   : >> { %2764 = vst [vmem:[#allocation37_spill] sm:$0xff] %v2369_v36  ;;  %v923_v0 = vmul.f32 %v2078_v43, %v921_v32  ;;  %v924_v59 = vmul.f32 %v2089_v48, %v921_v32  ;;  %v925_v44 = vmul.f32 %v2103_v55, %v921_v32  ;;  %v926_v51 = vmul.f32 %v2124_v1, %v921_v32  ;;  %v2426_v48 = vld [vmem:[#allocation2 + $0x68] sm:$0xff] }
 0x18a   : >> { %1513 = vst [vmem:[%s1908_s25 + $0x78] sm:$0xff] %v2324_v47  ;;  %v2421_v60 = vmul.f32 %v2134_v7, %v921_v32  ;;  %v2424_v43 = vmul.f32 %v2144_v22, %v921_v32  ;;  %v2433_v16 = vmul.f32 %v2152_v39, %v921_v32  ;;  %v673_v55 = vmul.f32 %v2396_v52, %v2181_v6 }
 0x18b   : >> { %1514 = vst [vmem:[%s1908_s25 + $0x80] sm:$0xff] %v2327_v54  ;;  %v638_v1 = vmul.f32 %v2213_v4, %v2006_v13  ;;  %v639_v7 = vmul.f32 %v2213_v4, %v2009_v14  ;;  %v674_v22 = vmul.f32 %v2398_v63, %v2181_v6  ;;  %v675_v20 = vmul.f32 %v2410_v24, %v2181_v6 }
 0x18c   : >> { %2765 = vst [vmem:[#allocation38_spill] sm:$0xff] %v2396_v52  ;;  %v676_v39 = vmul.f32 %v2412_v25, %v2181_v6  ;;  %v677_v32 = vmul.f32 %v2414_v26, %v2181_v6  ;;  %v930_v36 = vsub.f32 %v910_v33, %v923_v0  ;;  %v931_v41 = vsub.f32 %v911_v49, %v924_v59  ;;  %v2773_v59 = vld [vmem:[#allocation13_spill] sm:$0xff]  ;;  %v2778_v33 = vld [vmem:[#allocation20_spill] sm:$0xff] }
 0x18d   : >> { %2766 = vst [vmem:[#allocation39_spill] sm:$0xff] %v2398_v63  ;;  %v678_v13 = vmul.f32 %v2426_v48, %v2181_v6  ;;  %v679_v14 = vmul.f32 %v2428_v42, %v2181_v6  ;;  %v650_v4 = vpop.permute.xlu1 %649  ;;  %v932_v38 = vsub.f32 %v2335_v3, %v925_v44  ;;  %v933_v5 = vsub.f32 %v2339_v15, %v926_v51  ;;  %v2774_v3 = vld [vmem:[#allocation14_spill] sm:$0xff]  ;;  %v2775_v15 = vld [vmem:[#allocation15_spill] sm:$0xff] }
 0x18e   : >> { %1515 = vst [vmem:[%s1908_s25 + $0x88] sm:$0xff] %v2346_v62  ;;  %v934_v21 = vsub.f32 %v2343_v28, %v2421_v60  ;;  %v935_v17 = vsub.f32 %v2356_v57, %v2424_v43  ;;  %v652_v49 = vmul.f32 %v650_v4, %v1994_v9  ;;  %v653_v0 = vmul.f32 %v650_v4, %v1997_v10  ;;  %v2777_v43 = vld [vmem:[#allocation19_spill] sm:$0xff]  ;;  %v2779_v9 = vld [vmem:[#allocation21_spill] sm:$0xff]  ;;  %v2780_v10 = vld [vmem:[#allocation22_spill] sm:$0xff] }
 0x18f   : >> { %2767 = vst [vmem:[#allocation40_spill] sm:$0xff] %v2410_v24  ;;  %v654_v6 = vmul.f32 %v650_v4, %v2000_v11  ;;  %v655_v31 = vmul.f32 %v650_v4, %v2773_v59  ;;  %v656_v44 = vmul.f32 %v650_v4, %v2774_v3  ;;  %v657_v51 = vmul.f32 %v650_v4, %v2775_v15  ;;  %v2781_v11 = vld [vmem:[#allocation26_spill] sm:$0xff] }
 0x190   : >> { %2768 = vst [vmem:[#allocation41_spill] sm:$0xff] %v2412_v25  ;;  %v954_v60 = vsub.f32 %v930_v36, %v947_v40  ;;  %v660_v57 = vsub.f32 %v639_v7, %v653_v0  ;;  %v955_v59 = vsub.f32 %v931_v41, %v948_v34 }
 0x191   : >> { %2769 = vst [vmem:[#allocation42_spill] sm:$0xff] %v2414_v26  ;;  %v661_v26 = vsub.f32 %v2777_v43, %v654_v6  ;;  %v662_v25 = vsub.f32 %v2778_v33, %v655_v31  ;;  %v663_v24 = vsub.f32 %v2779_v9, %v656_v44  ;;  %v664_v63 = vsub.f32 %v2780_v10, %v657_v51 }
 0x192   : >> { %1516 = vst [vmem:[%s1908_s25 + $0x90] sm:$0xff] %v2363_v8  ;;  %v681_v3 = vsub.f32 %v660_v57, %v674_v22  ;;  %v1102_v6 = vstv %s1094_s18 }
 0x193   : >> { %2770 = vst [vmem:[#allocation43_spill] sm:$0xff] %v2426_v48  ;;  %v659_v48 = vsub.f32 %v638_v1, %v652_v49  ;;  %v682_v15 = vsub.f32 %v661_v26, %v675_v20  ;;  %v683_v2 = vsub.f32 %v662_v25, %v676_v39  ;;  %v685_v36 = vsub.f32 %v664_v63, %v678_v13  ;;  %v2782_v63 = vld [vmem:[#allocation17_spill] sm:$0xff]  ;;  %v2786_v57 = vld [vmem:[#allocation38_spill] sm:$0xff] }
 0x194   : >> { %2771 = vst [vmem:[#allocation44_spill] sm:$0xff] %v2428_v42  ;;  %v2776_v42 = vld [vmem:[#allocation16_spill] sm:$0xff]  ;;  %v956_v1 = vsub.f32 %v932_v38, %v2388_v53  ;;  %v696_v7 = vadd.f32 %v2290_v27, %v681_v3  ;;  %v959_v20 = vsub.f32 %v935_v17, %v2403_v56  ;;  %v2787_v9 = vld [vmem:[#allocation39_spill] sm:$0xff] }
 0x195   : >> { %1517 = vst [vmem:[%s1908_s25 + $0x98] sm:$0xff] %v2374_v23  ;;  %v658_v28 = vmul.f32 %v650_v4, %v2776_v42  ;;  %v684_v42 = vsub.f32 %v663_v24, %v677_v32  ;;  %v697_v4 = vadd.f32 %v2294_v30, %v682_v15  ;;  %v698_v41 = vadd.f32 %v2298_v58, %v683_v2 }
 0x196   : >> { %2772 = vst [vmem:[#allocation45_spill] sm:$0xff] %v2433_v16  ;;  %v680_v16 = vsub.f32 %v659_v48, %v673_v55  ;;  %v700_v25 = vadd.f32 %v2314_v29, %v685_v36  ;;  %v2489_v27 = vadd.f32 %v2324_v47, %v696_v7  ;;  %v1021_v22 = vmul.f32 %v2782_v63, %v696_v7 }
 0x197   : >> { %1518 = vst [vmem:[%s1908_s25 + $0xa0] sm:$0xff] %v2383_v37  ;;  %v665_v52 = vsub.f32 %v2781_v11, %v658_v28  ;;  %v699_v34 = vadd.f32 %v2309_v35, %v684_v42  ;;  %v2492_v30 = vadd.f32 %v2327_v54, %v697_v4  ;;  %v2496_v35 = vadd.f32 %v2346_v62, %v698_v41  ;;  %v2788_v11 = vld [vmem:[#allocation40_spill] sm:$0xff]  ;;  %v2789_v36 = vld [vmem:[#allocation41_spill] sm:$0xff] }
 0x198   : >> { %v695_v31 = vadd.f32 %v2286_v50, %v680_v16  ;;  %716 = vst [vmem:[%s1908_s25 + $0x8] sm:$0xff] %v696_v7  ;;  %v2502_v58 = vadd.f32 %v2374_v23, %v700_v25  ;;  %v962_v2 = vmul.f32 %v2489_v27, %v2215_v61  ;;  %v1022_v13 = vmul.f32 %v2782_v63, %v697_v4 }
 0x199   : >> { %v686_v40 = vsub.f32 %v665_v52, %v679_v14  ;;  %v957_v52 = vsub.f32 %v933_v5, %v2391_v19  ;;  %v958_v5 = vsub.f32 %v934_v21, %v2394_v45  ;;  %717 = vst [vmem:[%s1908_s25 + $0x10] sm:$0xff] %v697_v4  ;;  %v963_v53 = vmul.f32 %v2492_v30, %v2215_v61  ;;  %v2783_v14 = vld [vmem:[#allocation35_spill] sm:$0xff]  ;;  %v2790_v4 = vld [vmem:[#allocation42_spill] sm:$0xff] }
 0x19a   : >> { %715 = vst [vmem:[%s1908_s25] sm:$0xff] %v695_v31  ;;  %v2486_v50 = vadd.f32 %v2321_v18, %v695_v31  ;;  %v964_v19 = vmul.f32 %v2496_v35, %v2215_v61  ;;  %v966_v45 = vmul.f32 %v2502_v58, %v2215_v61  ;;  %v1020_v26 = vmul.f32 %v2782_v63, %v695_v31 }
 0x19b   : >> { %v701_v24 = vadd.f32 %v2318_v12, %v686_v40  ;;  %v2499_v12 = vadd.f32 %v2363_v8, %v699_v34  ;;  %718 = vst [vmem:[%s1908_s25 + $0x18] sm:$0xff] %v698_v41  ;;  %v969_v55 = vadd.f32 %v962_v2, %v955_v59  ;;  %v970_v39 = vadd.f32 %v963_v53, %v956_v1 }
 0x19c   : >> { %v961_v38 = vmul.f32 %v2486_v50, %v2215_v61  ;;  %719 = vst [vmem:[%s1908_s25 + $0x20] sm:$0xff] %v699_v34  ;;  %v971_v32 = vadd.f32 %v964_v19, %v957_v52  ;;  %v1023_v44 = vmul.f32 %v2782_v63, %v698_v41  ;;  %v973_v51 = vadd.f32 %v966_v45, %v959_v20  ;;  %v2792_v19 = vld [vmem:[#allocation44_spill] sm:$0xff]  ;;  %v2793_v20 = vld [vmem:[#allocation30_spill] sm:$0xff] }
 0x19d   : >> { %v2505_v29 = vadd.f32 %v2383_v37, %v701_v24  ;;  %v965_v21 = vmul.f32 %v2499_v12, %v2215_v61  ;;  %720 = vst [vmem:[%s1908_s25 + $0x28] sm:$0xff] %v700_v25  ;;  %v2784_v33 = vld [vmem:[#allocation45_spill] sm:$0xff]  ;;  %v1024_v17 = vmul.f32 %v2782_v63, %v699_v34  ;;  %v1025_v56 = vmul.f32 %v2782_v63, %v700_v25  ;;  %v2791_v34 = vld [vmem:[#allocation43_spill] sm:$0xff] }
 0x19e   : >> { %v968_v16 = vadd.f32 %v961_v38, %v954_v60  ;;  %v2785_v49 = vsub.f32 %v2783_v14, %v2784_v33  ;;  %721 = vst [vmem:[%s1908_s25 + $0x30] sm:$0xff] %v701_v24  ;;  %v1027_v43 = vadd.f32 %v1020_v26, %v2786_v57  ;;  %v1028_v10 = vadd.f32 %v1021_v22, %v2787_v9  ;;  %v2794_v14 = vld [vmem:[#allocation31_spill] sm:$0xff] }
 0x19f   : >> { %v967_v48 = vmul.f32 %v2505_v29, %v2215_v61  ;;  %v972_v61 = vadd.f32 %v965_v21, %v958_v5  ;;  %1545 = vst [vmem:[%s1908_s25 + $0x40] sm:$0xff] %v969_v55  ;;  %v1029_v59 = vadd.f32 %v1022_v13, %v2788_v11  ;;  %v2550_v3 = vmul.f32 %v2782_v63, %v969_v55  ;;  %v2799_v11 = vld [vmem:[#allocation37_spill] sm:$0xff] }
 0x1a0   : >> { %v960_v0 = vsub.f32 %v2785_v49, %v2406_v46  ;;  %1544 = vst [vmem:[%s1908_s25 + $0x38] sm:$0xff] %v968_v16  ;;  %v2541_v28 = vmul.f32 %v2782_v63, %v968_v16  ;;  %v1026_v46 = vmul.f32 %v2782_v63, %v701_v24  ;;  %v2553_v15 = vmul.f32 %v2782_v63, %v970_v39 }
 0x1a1   : >> { %1546 = vst [vmem:[%s1908_s25 + $0x48] sm:$0xff] %v970_v39  ;;  %v2556_v42 = vmul.f32 %v2782_v63, %v971_v32  ;;  %v1030_v40 = vadd.f32 %v1023_v44, %v2789_v36  ;;  %v2561_v1 = vmul.f32 %v2782_v63, %v972_v61  ;;  %v1103_v7 = vmul.f32 %v1102_v6, %v968_v16 }
 0x1a2   : >> { %v974_v60 = vadd.f32 %v967_v48, %v960_v0  ;;  %1547 = vst [vmem:[%s1908_s25 + $0x50] sm:$0xff] %v971_v32  ;;  %v1041_v31 = vsub.f32 %v1027_v43, %v2541_v28  ;;  %v1031_v41 = vadd.f32 %v1024_v17, %v2790_v4  ;;  %v1032_v25 = vadd.f32 %v1025_v56, %v2791_v34  ;;  %v2797_v56 = vld [vmem:[#allocation34_spill] sm:$0xff] }
 0x1a3   : >> { %1548 = vst [vmem:[%s1908_s25 + $0x58] sm:$0xff] %v972_v61  ;;  %v2568_v24 = vmul.f32 %v2782_v63, %v973_v51  ;;  %v1042_v52 = vsub.f32 %v1028_v10, %v2550_v3  ;;  %v1043_v38 = vsub.f32 %v1029_v59, %v2553_v15  ;;  %v1104_v2 = vmul.f32 %v1102_v6, %v969_v55  ;;  %v2800_v4 = vld [vmem:[#allocation18_spill] sm:$0xff] }
 0x1a4   : >> { %1549 = vst [vmem:[%s1908_s25 + $0x60] sm:$0xff] %v973_v51  ;;  %v2573_v5 = vmul.f32 %v2782_v63, %v974_v60  ;;  %v1105_v53 = vmul.f32 %v1102_v6, %v970_v39  ;;  %v1033_v21 = vadd.f32 %v1026_v46, %v2792_v19  ;;  %v1044_v45 = vsub.f32 %v1030_v40, %v2556_v42  ;;  %v2795_v39 = vld [vmem:[#allocation32_spill] sm:$0xff] }
 0x1a5   : >> { %1550 = vst [vmem:[%s1908_s25 + $0x68] sm:$0xff] %v974_v60  ;;  %v1106_v26 = vmul.f32 %v1102_v6, %v971_v32  ;;  %v1107_v48 = vmul.f32 %v1102_v6, %v972_v61  ;;  %v1045_v16 = vsub.f32 %v1031_v41, %v2561_v1  ;;  %v1108_v22 = vmul.f32 %v1102_v6, %v973_v51  ;;  %v2796_v61 = vld [vmem:[#allocation33_spill] sm:$0xff] }
 0x1a6   : >> { %1048 = vst [vmem:[#allocation2] sm:$0xff] %v1041_v31  ;;  %v1110_v13 = vadd.f32 %v1103_v7, %v2793_v20  ;;  %v1111_v33 = vadd.f32 %v1104_v2, %v2794_v14  ;;  %v1046_v49 = vsub.f32 %v1032_v25, %v2568_v24  ;;  %v1109_v55 = vmul.f32 %v1102_v6, %v974_v60 }
 0x1a7   : >> { %1049 = vst [vmem:[#allocation2 + $0x38] sm:$0xff] %v1042_v52  ;;  %v1112_v0 = vadd.f32 %v1105_v53, %v2795_v39  ;;  %v1117_v44 = vmul.f32 %v2782_v63, %v2486_v50  ;;  %v1047_v32 = vsub.f32 %v1033_v21, %v2573_v5  ;;  %v1113_v17 = vadd.f32 %v1106_v26, %v2796_v61  ;;  %v2798_v50 = vld [vmem:[#allocation36_spill] sm:$0xff]  ;;  %v2804_v21 = vld [vmem:[#allocation27_spill] sm:$0xff] }
 0x1a8   : >> { %1050 = vst [vmem:[#allocation2 + $0x50] sm:$0xff] %v1043_v38  ;;  %v1118_v51 = vmul.f32 %v2782_v63, %v2489_v27  ;;  %v1114_v46 = vadd.f32 %v1107_v48, %v2797_v56  ;;  %v1119_v57 = vmul.f32 %v2782_v63, %v2492_v30  ;;  %v1169_v60 = vmul.f32 %v2782_v63, %v2321_v18  ;;  %v2805_v26 = vld [vmem:[#allocation28_spill] sm:$0xff] }
 0x1a9   : >> { %1051 = vst [vmem:[#allocation2 + $0x18] sm:$0xff] %v1044_v45  ;;  %v1124_v6 = vsub.f32 %v1110_v13, %v1117_v44  ;;  %v1115_v43 = vadd.f32 %v1108_v22, %v2798_v50  ;;  %v1120_v9 = vmul.f32 %v2782_v63, %v2496_v35  ;;  %v1170_v27 = vmul.f32 %v2782_v63, %v2324_v47 }
 0x1aa   : >> { %1052 = vst [vmem:[#allocation2 + $0x30] sm:$0xff] %v1045_v16  ;;  %v1125_v10 = vsub.f32 %v1111_v33, %v1118_v51  ;;  %v1116_v59 = vadd.f32 %v1109_v55, %v2799_v11  ;;  %v1121_v30 = vmul.f32 %v2782_v63, %v2499_v12  ;;  %v1126_v36 = vsub.f32 %v1112_v0, %v1119_v57 }
 0x1ab   : >> { %1053 = vst [vmem:[#allocation2 + $0x68] sm:$0xff] %v1046_v49  ;;  %v1171_v18 = vmul.f32 %v2782_v63, %v2327_v54  ;;  %v1122_v40 = vmul.f32 %v2782_v63, %v2502_v58  ;;  %v1127_v31 = vsub.f32 %v1113_v17, %v1120_v9  ;;  %v1172_v35 = vmul.f32 %v2782_v63, %v2346_v62  ;;  %v2801_v58 = vld [vmem:[#allocation23_spill] sm:$0xff] }
 0x1ac   : >> { %1054 = vst [vmem:[#allocation2 + $0x78] sm:$0xff] %v1047_v32  ;;  %v1123_v47 = vmul.f32 %v2782_v63, %v2505_v29  ;;  %v1128_v7 = vsub.f32 %v1114_v46, %v1121_v30  ;;  %v1173_v12 = vmul.f32 %v2782_v63, %v2363_v8  ;;  %v1176_v41 = vadd.f32 %v1169_v60, %v2800_v4  ;;  %v2802_v29 = vld [vmem:[#allocation24_spill] sm:$0xff]  ;;  %v2803_v8 = vld [vmem:[#allocation25_spill] sm:$0xff] }
 0x1ad   : >> { %1131 = vst [vmem:[#allocation2 + $0x80] sm:$0xff] %v1124_v6  ;;  %v1129_v34 = vsub.f32 %v1115_v43, %v1122_v40  ;;  %v1174_v54 = vmul.f32 %v2782_v63, %v2374_v23  ;;  %v1177_v25 = vadd.f32 %v1170_v27, %v2801_v58  ;;  %v1175_v62 = vmul.f32 %v2782_v63, %v2383_v37  ;;  %v2806_v63 = vld [vmem:[#allocation29_spill] sm:$0xff] }
 0x1ae   : >> { %1132 = vst [vmem:[#allocation2 + $0x8] sm:$0xff] %v1125_v10  ;;  %v1130_v52 = vsub.f32 %v1116_v59, %v1123_v47  ;;  %v1178_v38 = vadd.f32 %v1171_v18, %v2802_v29  ;;  %v1190_v2 = vsub.f32 %v1176_v41, %v2541_v28  ;;  %v1179_v53 = vadd.f32 %v1172_v35, %v2803_v8 }
 0x1af   : >> { %1133 = vst [vmem:[#allocation2 + $0x88] sm:$0xff] %v1126_v36  ;;  %v1191_v19 = vsub.f32 %v1177_v25, %v2550_v3  ;;  %v1180_v45 = vadd.f32 %v1173_v12, %v2804_v21  ;;  %v1181_v48 = vadd.f32 %v1174_v54, %v2805_v26  ;;  %v1182_v16 = vadd.f32 %v1175_v62, %v2806_v63 }
 0x1b0   : >> { %1134 = vst [vmem:[#allocation2 + $0x28] sm:$0xff] %v1127_v31  ;;  %v1192_v23 = vsub.f32 %v1178_v38, %v2553_v15  ;;  %v1193_v37 = vsub.f32 %v1179_v53, %v2556_v42 }
 0x1b1   : >> { %1135 = vst [vmem:[#allocation2 + $0x40] sm:$0xff] %v1128_v7  ;;  %v1194_v22 = vsub.f32 %v1180_v45, %v2561_v1  ;;  %v1195_v28 = vsub.f32 %v1181_v48, %v2568_v24  ;;  %v1196_v3 = vsub.f32 %v1182_v16, %v2573_v5 }
 0x1b2   : >> { %1136 = vst [vmem:[#allocation2 + $0x60] sm:$0xff] %v1129_v34 }
 0x1b3   : >> { %1137 = vst [vmem:[#allocation2 + $0x90] sm:$0xff] %v1130_v52 }
 0x1b4   : >> { %1197 = vst [vmem:[#allocation2 + $0x98] sm:$0xff] %v1190_v2 }
 0x1b5   : >> { %1198 = vst [vmem:[#allocation2 + $0x58] sm:$0xff] %v1191_v19 }
 0x1b6   : >> { %1199 = vst [vmem:[#allocation2 + $0x20] sm:$0xff] %v1192_v23  ;;  %578 = sbr.rel (!%p576_p10) target bundleno = 145 (0x91), region = 309 }
 0x1b7   : >> { %1200 = vst [vmem:[#allocation2 + $0x48] sm:$0xff] %v1193_v37 }
 0x1b8   : >> { %1201 = vst [vmem:[#allocation2 + $0x70] sm:$0xff] %v1194_v22 }
 0x1b9   : >> { %1202 = vst [vmem:[#allocation2 + $0x10] sm:$0xff] %v1195_v28 }
 0x1ba   : >> { %1203 = vst [vmem:[#allocation2 + $0xa0] sm:$0xff] %v1196_v3 }
 0x1bb   : > { %1221 = sbr.rel (!%p1765_p5) target bundleno = 468 (0x1d4), region = 169  ;;  %v1237_v15 = vld [vmem:[%s1908_s25] sm:$0xff] (%p1765_p5)  ;;  %v1239_v42 = vld [vmem:[%s1908_s25 + $0x8] sm:$0xff] (%p1765_p5)  ;;  %v1241_v1 = vld [vmem:[%s1908_s25 + $0x10] sm:$0xff] (%p1765_p5) }
 0x1bc   : > { %s1604_s20 = smul.u32 (%p1765_p5), 56, %s1746_s0  ;;  %v1243_v24 = vld [vmem:[%s1908_s25 + $0x18] sm:$0xff] (%p1765_p5)  ;;  %v1245_v5 = vld [vmem:[%s1908_s25 + $0x20] sm:$0xff] (%p1765_p5)  ;;  %v1247_v20 = vld [vmem:[%s1908_s25 + $0x28] sm:$0xff] (%p1765_p5) }
 0x1bd   : > { %v1249_v13 = vld [vmem:[%s1908_s25 + $0x30] sm:$0xff] (%p1765_p5)  ;;  %v1251_v14 = vld [vmem:[%s1908_s25 + $0x38] sm:$0xff] (%p1765_p5)  ;;  %v1253_v33 = vld [vmem:[%s1908_s25 + $0x40] sm:$0xff] (%p1765_p5) }
 0x1be   : > { %s2642_s29 = scalar_lea.vmem (%p1765_p5), %s2708_s5, %s1604_s20  ;;  %v1255_v49 = vld [vmem:[%s1908_s25 + $0x48] sm:$0xff] (%p1765_p5)  ;;  %v1257_v55 = vld [vmem:[%s1908_s25 + $0x50] sm:$0xff] (%p1765_p5)  ;;  %v1259_v39 = vld [vmem:[%s1908_s25 + $0x58] sm:$0xff] (%p1765_p5) }
 0x1bf   : > { %1238 = vst [vmem:[%s2642_s29] sm:$0xff] (%p1765_p5), %v1237_v15  ;;  %v1261_v0 = vld [vmem:[%s1908_s25 + $0x60] sm:$0xff] (%p1765_p5)  ;;  %v1263_v44 = vld [vmem:[%s1908_s25 + $0x68] sm:$0xff] (%p1765_p5)  ;;  %v1265_v32 = vld [vmem:[%s1908_s25 + $0x70] sm:$0xff] (%p1765_p5) }
 0x1c0   : > { %1240 = vst [vmem:[%s2642_s29 + $0x8] sm:$0xff] %v1239_v42  ;;  %v1267_v61 = vld [vmem:[%s1908_s25 + $0x78] sm:$0xff]  ;;  %v1269_v17 = vld [vmem:[%s1908_s25 + $0x80] sm:$0xff]  ;;  %v1271_v51 = vld [vmem:[%s1908_s25 + $0x88] sm:$0xff] }
 0x1c1   : > { %1242 = vst [vmem:[%s2642_s29 + $0x10] sm:$0xff] %v1241_v1  ;;  %v1273_v56 = vld [vmem:[%s1908_s25 + $0x90] sm:$0xff]  ;;  %v1275_v46 = vld [vmem:[%s1908_s25 + $0x98] sm:$0xff]  ;;  %v1277_v57 = vld [vmem:[%s1908_s25 + $0xa0] sm:$0xff] }
 0x1c2   : > { %1244 = vst [vmem:[%s2642_s29 + $0x18] sm:$0xff] %v1243_v24 }
 0x1c3   : > { %1246 = vst [vmem:[%s2642_s29 + $0x20] sm:$0xff] %v1245_v5 }
 0x1c4   : > { %1248 = vst [vmem:[%s2642_s29 + $0x28] sm:$0xff] %v1247_v20 }
 0x1c5   : > { %1250 = vst [vmem:[%s2642_s29 + $0x30] sm:$0xff] %v1249_v13 }
 0x1c6   : > { %1252 = vst [vmem:[%s2642_s29 + $0x70] sm:$0xff] %v1251_v14 }
 0x1c7   : > { %1254 = vst [vmem:[%s2642_s29 + $0x78] sm:$0xff] %v1253_v33 }
 0x1c8   : > { %1256 = vst [vmem:[%s2642_s29 + $0x80] sm:$0xff] %v1255_v49 }
 0x1c9   : > { %1258 = vst [vmem:[%s2642_s29 + $0x88] sm:$0xff] %v1257_v55 }
 0x1ca   : > { %1260 = vst [vmem:[%s2642_s29 + $0x90] sm:$0xff] %v1259_v39 }
 0x1cb   : > { %1262 = vst [vmem:[%s2642_s29 + $0x98] sm:$0xff] %v1261_v0 }
 0x1cc   : > { %1264 = vst [vmem:[%s2642_s29 + $0xa0] sm:$0xff] %v1263_v44 }
 0x1cd   : > { %1266 = vst [vmem:[%s2642_s29 + $0xe0] sm:$0xff] %v1265_v32 }
 0x1ce   : > { %1268 = vst [vmem:[%s2642_s29 + $0xe8] sm:$0xff] %v1267_v61 }
 0x1cf   : > { %1270 = vst [vmem:[%s2642_s29 + $0xf0] sm:$0xff] %v1269_v17 }
 0x1d0   : > { %1272 = vst [vmem:[%s2642_s29 + $0xf8] sm:$0xff] %v1271_v51 }
 0x1d1   : > { %1274 = vst [vmem:[%s2642_s29 + $0x100] sm:$0xff] %v1273_v56 }
 0x1d2   : > { %1276 = vst [vmem:[%s2642_s29 + $0x108] sm:$0xff] %v1275_v46 }
 0x1d3   : > { %1278 = vst [vmem:[%s2642_s29 + $0x110] sm:$0xff] %v1277_v57 }
 0x1d4 PF: > { %1284 = sbr.rel (!%p1765_p5) target bundleno = 473 (0x1d9), region = 192  ;;  %s1593_s30 = sshll.u32 (%p1765_p5), %s1746_s0, 3  ;;  %v1319_v6 = vld [vmem:[%s1951_s24] sm:$0xff] (%p1765_p5)  ;;  %v1321_v60 = vld [vmem:[%s1951_s24 + $0x8] sm:$0xff] (%p1765_p5)  ;;  %v1323_v50 = vld [vmem:[%s1951_s24 + $0x10] sm:$0xff] (%p1765_p5) }
 0x1d5   : > { %s1286_s23 = scalar_lea.vmem (%p1765_p5), %s2709_s6, %s1593_s30 }
 0x1d6   : > { %1320 = vst [vmem:[%s1286_s23] sm:$0xff] (%p1765_p5), %v1319_v6 }
 0x1d7   : > { %1322 = vst [vmem:[%s1286_s23 + $0x10] sm:$0xff] (%p1765_p5), %v1321_v60 }
 0x1d8   : > { %1324 = vst [vmem:[%s1286_s23 + $0x20] sm:$0xff] (%p1765_p5), %v1323_v50 }
 0x1d9 PF: > { %p22_p11 = scmp.ge.s32.totalorder %s1749_s28, 4   ;;  %s2807_s25 = smov %s1679_s26 }
 0x1da   : > { %s2808_s26 = smov %s1759_s7  ;;  %s2809_s27 = smov %s1749_s28 }
 0x1db   :  { %24 = sbr.rel (!%p22_p11) target bundleno = 8 (0x8), region = 320 }

</bundles_post_ra>
